<compile_context>
chip_gen: v5e
topology: v5e:2x2
jax: 0.10.0
libtpu: 0.0.40
codegen_flags: <defaults>
</compile_context>

<pallas_src>
import functools
import math

import jax
import jax.numpy as jnp
from jax.experimental import pallas as pl
from jax.experimental.pallas import tpu as pltpu


# ----------------------------- in-kernel helpers ----------------------------

def _layernorm(x, g, b, eps=1e-5):
    mu = jnp.mean(x, axis=-1, keepdims=True)
    var = jnp.mean(jnp.square(x - mu), axis=-1, keepdims=True)
    return (x - mu) * jax.lax.rsqrt(var + eps) * g + b


def _gelu_exact(x):
    # exact (erf) GELU, matching torch.nn.GELU() default
    return 0.5 * x * (1.0 + jax.lax.erf(x * (1.0 / math.sqrt(2.0))))


# ------------------------------ fused kernel --------------------------------

def _fused_forward_kernel(
        xpad_ref, y_ref, ew_ref, eadd_ref,
        ln1_g_ref, ln1_b_ref, fc_w_ref, fc_b_ref,
        q_w_ref, k_w_ref, v_w_ref, out_w_ref, out_b_ref,
        ln2_g_ref, ln2_b_ref, ff1_w_ref, ff1_b_ref, ff2_w_ref, ff2_b_ref,
        hg_ref, hb_ref, hw_ref, hbias_ref,
        o_ref, logits_ref,
        x_s,
        *, heads, dim_head, scale):
    """Grid = (batch, depth). One full transformer layer per step; the
    patch-embedding runs under d==0 and the classification head under
    d==depth-1. The residual stream x lives in the VMEM scratch `x_s`."""
    d = pl.program_id(1)
    last = pl.num_programs(1) - 1
    bf16 = jnp.bfloat16
    f32 = jnp.float32

    # ---- depth step 0: patch-embed (+linner) + cls token + pos embedding ----
    @pl.when(d == 0)
    def _():
        # xpad row 0 is all zeros (cls slot); eadd carries cls+pos / bias+pos.
        z = jnp.dot(xpad_ref[...], ew_ref[...], preferred_element_type=f32)
        x_s[...] = z + eadd_ref[...]

    x = x_s[...]                         # (N, D) f32 residual stream
    y = y_ref[...]                       # (N, D) f32 cross data
    inner = heads * dim_head

    # ---- PreNorm + opera (fc) / q,k,v projections ----
    xn = _layernorm(x, ln1_g_ref[...], ln1_b_ref[...])
    xn_b = xn.astype(bf16)
    y_b = y.astype(bf16)
    fc_w = fc_w_ref[...]                 # (D, Dh) bf16
    fc_b = fc_b_ref[...]                 # (1, Dh) f32
    oq = jnp.dot(xn_b, fc_w, preferred_element_type=f32) + fc_b   # opera_Q
    ok = jnp.dot(y_b, fc_w, preferred_element_type=f32) + fc_b    # opera_K == opera_V
    q = jnp.dot(xn_b, q_w_ref[...], preferred_element_type=f32)   # (N, inner)
    k = jnp.dot(xn_b, k_w_ref[...], preferred_element_type=f32)
    v = jnp.dot(xn_b, v_w_ref[...], preferred_element_type=f32)

    oq_s = oq * scale                    # fold softmax scale into opera_Q
    out_w = out_w_ref[...]               # (inner, D) bf16
    dn = (((1,), (1,)), ((), ()))        # contract dim 1 of both -> q @ k.T

    # ---- multi-head cross attention, unrolled over heads ----
    acc = None
    for h in range(heads):
        lo = h * dim_head
        hi = lo + dim_head
        qh = (q[:, lo:hi] * oq_s).astype(bf16)
        kh = (k[:, lo:hi] * ok).astype(bf16)
        vh = (v[:, lo:hi] * ok).astype(bf16)
        dots = jax.lax.dot_general(qh, kh, dn, preferred_element_type=f32)
        dots = dots - jnp.max(dots, axis=-1, keepdims=True)
        p = jnp.exp(dots)
        p = p * pl.reciprocal(jnp.sum(p, axis=-1, keepdims=True), approx=True)
        oh = jnp.dot(p.astype(bf16), vh, preferred_element_type=f32)   # (N, Dh)
        # head merge + to_out:  out @ out_w == sum_h oh @ out_w[h*Dh:(h+1)*Dh]
        contrib = jnp.dot(oh.astype(bf16), out_w[lo:hi, :],
                          preferred_element_type=f32)                  # (N, D)
        acc = contrib if acc is None else acc + contrib
    attn_out = acc + out_b_ref[...]

    # ---- residual: x = attn(LN1(x), y) + x + y ----
    x1 = attn_out + x + y

    # ---- PreNorm + FeedForward ----
    xn2 = _layernorm(x1, ln2_g_ref[...], ln2_b_ref[...])
    hmid = jnp.dot(xn2.astype(bf16), ff1_w_ref[...],
                   preferred_element_type=f32) + ff1_b_ref[...]
    hmid = _gelu_exact(hmid)
    ff = jnp.dot(hmid.astype(bf16), ff2_w_ref[...],
                 preferred_element_type=f32) + ff2_b_ref[...]
    x_new = x1 + ff
    x_s[...] = x_new

    # ---- last depth step: emit x_out and the classification head ----
    @pl.when(d == last)
    def _():
        o_ref[...] = x_new.astype(o_ref.dtype)
        cls_tok = x_new[0:1, :]                                    # pool='cls'
        cn = _layernorm(cls_tok, hg_ref[...], hb_ref[...])
        logits = jnp.dot(cn.astype(bf16), hw_ref[...],
                         preferred_element_type=f32) + hbias_ref[...]
        logits_ref[...] = logits.astype(logits_ref.dtype)


# ------------------------------- model glue --------------------------------

def forward(params, img, cross_data, *, patch_size, heads, dim_head):
    """Eval-mode forward of cross_transformer as ONE fused pallas_call."""
    f32, bf16 = jnp.float32, jnp.bfloat16
    B, C, Lf = img.shape
    P = patch_size
    T = Lf // P
    N = T + 1
    CP = C * P
    dim = params["lin_w"].shape[1]
    Dh = dim_head
    inner = heads * dim_head
    L = len(params["layers"])
    M = params["layers"][0]["ff1_w"].shape[1]
    num_classes = params["head_w"].shape[1]
    scale = dim_head ** (-0.5)

    # --- eval-mode weight folding: Conv1d(as matmul) + linner -> one matmul ---
    # TODO(synk): when porting real torch Conv1d weights, conv_w here must be
    # weight.reshape(OC, C*P).T (kernel_size == stride == P unfold layout).
    ew = (params["conv_w"] @ params["lin_w"]).astype(bf16)                # (CP, dim)
    eb = params["conv_b"] @ params["lin_w"] + params["lin_b"]             # (dim,)
    pos = params["pos_embedding"][0, :N, :]                               # (N, dim)
    cls = params["cls_token"][0]                                          # (1, dim)
    # additive term: row 0 = cls + pos[0]; rows 1.. = embed bias + pos[1..]
    eadd = jnp.concatenate([cls + pos[:1], eb[None, :] + pos[1:]],
                           axis=0).astype(f32)                            # (N, dim)

    # --- unfold Conv1d input into patches; prepend zero row for the cls slot ---
    xp = img.reshape(B, C, T, P).transpose(0, 2, 1, 3).reshape(B, T, CP)
    xpad = jnp.concatenate([jnp.zeros((B, 1, CP), img.dtype), xp],
                           axis=1).astype(bf16)                           # (B, N, CP)

    # --- stack per-layer weights along leading depth axis; pre-split qkv ---
    def stk(name):
        return jnp.stack([lp[name] for lp in params["layers"]], axis=0)

    ln1_g = stk("ln1_g")[:, None, :]
    ln1_b = stk("ln1_b")[:, None, :]
    fc_w = stk("fc_w").astype(bf16)
    fc_b = stk("fc_b")[:, None, :]
    qkv_w = stk("qkv_w")                                                  # (L, dim, 3*inner)
    q_w = qkv_w[:, :, 0 * inner:1 * inner].astype(bf16)
    k_w = qkv_w[:, :, 1 * inner:2 * inner].astype(bf16)
    v_w = qkv_w[:, :, 2 * inner:3 * inner].astype(bf16)
    out_w = stk("out_w").astype(bf16)
    out_b = stk("out_b")[:, None, :]
    ln2_g = stk("ln2_g")[:, None, :]
    ln2_b = stk("ln2_b")[:, None, :]
    ff1_w = stk("ff1_w").astype(bf16)
    ff1_b = stk("ff1_b")[:, None, :]
    ff2_w = stk("ff2_w").astype(bf16)
    ff2_b = stk("ff2_b")[:, None, :]

    hg = params["head_ln_g"][None, :]
    hb = params["head_ln_b"][None, :]
    hw = params["head_w"].astype(bf16)
    hbias = params["head_b"][None, :]

    def batch_spec(rows, cols):
        return pl.BlockSpec((None, rows, cols), lambda b, d: (b, 0, 0))

    def layer_spec(rows, cols):
        return pl.BlockSpec((None, rows, cols), lambda b, d: (d, 0, 0))

    def const_spec(rows, cols):
        return pl.BlockSpec((rows, cols), lambda b, d: (0, 0))

    kern = functools.partial(_fused_forward_kernel, heads=heads,
                             dim_head=dim_head, scale=scale)

    x_out, logits3 = pl.pallas_call(
        kern,
        out_shape=(jax.ShapeDtypeStruct((B, N, dim), f32),
                   jax.ShapeDtypeStruct((B, 1, num_classes), f32)),
        grid=(B, L),
        in_specs=[
            batch_spec(N, CP),              # xpad (patches + cls slot)
            batch_spec(N, dim),             # y (cross_data)
            const_spec(CP, dim),            # folded embed weight
            const_spec(N, dim),             # folded embed bias + cls + pos
            layer_spec(1, dim),             # ln1 gamma
            layer_spec(1, dim),             # ln1 beta
            layer_spec(dim, Dh),            # fc weight
            layer_spec(1, Dh),              # fc bias
            layer_spec(dim, inner),         # q weight
            layer_spec(dim, inner),         # k weight
            layer_spec(dim, inner),         # v weight
            layer_spec(inner, dim),         # to_out weight
            layer_spec(1, dim),             # to_out bias
            layer_spec(1, dim),             # ln2 gamma
            layer_spec(1, dim),             # ln2 beta
            layer_spec(dim, M),             # ff1 weight
            layer_spec(1, M),               # ff1 bias
            layer_spec(M, dim),             # ff2 weight
            layer_spec(1, dim),             # ff2 bias
            const_spec(1, dim),             # head LN gamma
            const_spec(1, dim),             # head LN beta
            const_spec(dim, num_classes),   # head weight
            const_spec(1, num_classes),     # head bias
        ],
        out_specs=(batch_spec(N, dim),
                   batch_spec(1, num_classes)),
        scratch_shapes=[pltpu.VMEM((N, dim), f32)],
        compiler_params=pltpu.CompilerParams(
            dimension_semantics=("parallel", "arbitrary")),
    )(xpad, cross_data.astype(f32), ew, eadd,
      ln1_g, ln1_b, fc_w, fc_b, q_w, k_w, v_w, out_w, out_b,
      ln2_g, ln2_b, ff1_w, ff1_b, ff2_w, ff2_b,
      hg, hb, hw, hbias)

    return logits3[:, 0, :], x_out


# ----------------------------- parameter init -------------------------------

def init_params(key, *, origin_channel, patch_size, dim, depth, heads,
                dim_head, mlp_dim, num_classes, embedding_channel):
    keys = iter(jax.random.split(key, 16 + 16 * depth))

    def nrm(shape, scale=0.05):
        return (scale * jax.random.normal(next(keys), shape)).astype(jnp.float32)

    C, P = origin_channel, patch_size
    oc = C * P
    inner = heads * dim_head
    params = {
        "conv_w": nrm((C * P, oc)),      # flattened Conv1d weight, pre-transposed
        "conv_b": nrm((oc,)),
        "lin_w": nrm((oc, dim)),
        "lin_b": nrm((dim,)),
        "pos_embedding": nrm((1, embedding_channel + 1, dim), scale=1.0),
        "cls_token": nrm((1, 1, dim), scale=1.0),
        "head_ln_g": jnp.ones((dim,), jnp.float32),
        "head_ln_b": jnp.zeros((dim,), jnp.float32),
        "head_w": nrm((dim, num_classes)),
        "head_b": nrm((num_classes,)),
        "layers": [],
    }
    for _ in range(depth):
        params["layers"].append({
            "ln1_g": jnp.ones((dim,), jnp.float32),
            "ln1_b": jnp.zeros((dim,), jnp.float32),
            "fc_w": nrm((dim, dim_head)),
            "fc_b": nrm((dim_head,)),
            "qkv_w": nrm((dim, 3 * inner)),
            "out_w": nrm((inner, dim)),
            "out_b": nrm((dim,)),
            "ln2_g": jnp.ones((dim,), jnp.float32),
            "ln2_b": jnp.zeros((dim,), jnp.float32),
            "ff1_w": nrm((dim, mlp_dim)),
            "ff1_b": nrm((mlp_dim,)),
            "ff2_w": nrm((mlp_dim, dim)),
            "ff2_b": nrm((dim,)),
        })
    return params


# ---------------------------------- main ------------------------------------

if __name__ == "__main__":
    B = 2
    origin_channel = 4
    patch_size = 4
    feature_len = 32                 # Conv1d input length -> T = 8 patches
    embedding_channel = 8            # == T so pos_embedding covers n+1 tokens
    dim = 32
    depth = 2
    heads = 2
    dim_head = 16
    mlp_dim = 64
    num_classes = 5
    T = feature_len // patch_size
    N = T + 1                        # tokens after cls prepend

    key = jax.random.PRNGKey(0)
    k_param, k_img, k_cross = jax.random.split(key, 3)
    params = init_params(
        k_param,
        origin_channel=origin_channel, patch_size=patch_size, dim=dim,
        depth=depth, heads=heads, dim_head=dim_head, mlp_dim=mlp_dim,
        num_classes=num_classes, embedding_channel=embedding_channel)

    img = jax.random.normal(k_img, (B, origin_channel, feature_len), jnp.float32)
    cross_data = jax.random.normal(k_cross, (B, N, dim), jnp.float32)

    fwd = jax.jit(functools.partial(
        forward, patch_size=patch_size, heads=heads, dim_head=dim_head))
    logits, x_out = fwd(params, img, cross_data)
    jax.block_until_ready((logits, x_out))

    assert logits.shape == (B, num_classes)
    assert x_out.shape == (B, N, dim)
    assert bool(jnp.all(jnp.isfinite(logits))) and bool(jnp.all(jnp.isfinite(x_out)))
    # TODO(synk): training-mode DropKey (torch.bernoulli mask) and dropout are
    # intentionally omitted — this implements the eval-mode forward path.
    print("KERNEL_OK")
</pallas_src>

<mosaic_0001>
module attributes {stable_mosaic.version = 11 : i64} {
  func.func @_fused_forward_kernel(%arg0: i32, %arg1: i32, %arg2: memref<1x9x16xbf16, #tpu.memory_space<vmem>>, %arg3: memref<1x9x32xf32, #tpu.memory_space<vmem>>, %arg4: memref<16x32xbf16, #tpu.memory_space<vmem>>, %arg5: memref<9x32xf32, #tpu.memory_space<vmem>>, %arg6: memref<1x1x32xf32, #tpu.memory_space<vmem>>, %arg7: memref<1x1x32xf32, #tpu.memory_space<vmem>>, %arg8: memref<1x32x16xbf16, #tpu.memory_space<vmem>>, %arg9: memref<1x1x16xf32, #tpu.memory_space<vmem>>, %arg10: memref<1x32x32xbf16, #tpu.memory_space<vmem>>, %arg11: memref<1x32x32xbf16, #tpu.memory_space<vmem>>, %arg12: memref<1x32x32xbf16, #tpu.memory_space<vmem>>, %arg13: memref<1x32x32xbf16, #tpu.memory_space<vmem>>, %arg14: memref<1x1x32xf32, #tpu.memory_space<vmem>>, %arg15: memref<1x1x32xf32, #tpu.memory_space<vmem>>, %arg16: memref<1x1x32xf32, #tpu.memory_space<vmem>>, %arg17: memref<1x32x64xbf16, #tpu.memory_space<vmem>>, %arg18: memref<1x1x64xf32, #tpu.memory_space<vmem>>, %arg19: memref<1x64x32xbf16, #tpu.memory_space<vmem>>, %arg20: memref<1x1x32xf32, #tpu.memory_space<vmem>>, %arg21: memref<1x32xf32, #tpu.memory_space<vmem>>, %arg22: memref<1x32xf32, #tpu.memory_space<vmem>>, %arg23: memref<32x5xbf16, #tpu.memory_space<vmem>>, %arg24: memref<1x5xf32, #tpu.memory_space<vmem>>, %arg25: memref<1x9x32xf32, #tpu.memory_space<vmem>>, %arg26: memref<1x1x5xf32, #tpu.memory_space<vmem>>, %arg27: memref<9x32xf32, #tpu.memory_space<vmem>>) attributes {dimension_semantics = [#tpu.dimension_semantics<parallel>, #tpu.dimension_semantics<arbitrary>], iteration_bounds = array<i64: 2, 2>, scalar_prefetch = 0 : i64, scratch_operands = 1 : i64, tpu.core_type = #tpu.core_type<tc>, window_params = [{transform_indices = @transform_0, window_bounds = array<i64: 1, 9, 16>}, {transform_indices = @transform_1, window_bounds = array<i64: 1, 9, 32>}, {pipeline_mode = #tpu.pipeline_mode<synchronous>, transform_indices = @transform_2, window_bounds = array<i64: 16, 32>}, {pipeline_mode = #tpu.pipeline_mode<synchronous>, transform_indices = @transform_3, window_bounds = array<i64: 9, 32>}, {transform_indices = @transform_4, window_bounds = array<i64: 1, 1, 32>}, {transform_indices = @transform_5, window_bounds = array<i64: 1, 1, 32>}, {transform_indices = @transform_6, window_bounds = array<i64: 1, 32, 16>}, {transform_indices = @transform_7, window_bounds = array<i64: 1, 1, 16>}, {transform_indices = @transform_8, window_bounds = array<i64: 1, 32, 32>}, {transform_indices = @transform_9, window_bounds = array<i64: 1, 32, 32>}, {transform_indices = @transform_10, window_bounds = array<i64: 1, 32, 32>}, {transform_indices = @transform_11, window_bounds = array<i64: 1, 32, 32>}, {transform_indices = @transform_12, window_bounds = array<i64: 1, 1, 32>}, {transform_indices = @transform_13, window_bounds = array<i64: 1, 1, 32>}, {transform_indices = @transform_14, window_bounds = array<i64: 1, 1, 32>}, {transform_indices = @transform_15, window_bounds = array<i64: 1, 32, 64>}, {transform_indices = @transform_16, window_bounds = array<i64: 1, 1, 64>}, {transform_indices = @transform_17, window_bounds = array<i64: 1, 64, 32>}, {transform_indices = @transform_18, window_bounds = array<i64: 1, 1, 32>}, {pipeline_mode = #tpu.pipeline_mode<synchronous>, transform_indices = @transform_19, window_bounds = array<i64: 1, 32>}, {pipeline_mode = #tpu.pipeline_mode<synchronous>, transform_indices = @transform_20, window_bounds = array<i64: 1, 32>}, {pipeline_mode = #tpu.pipeline_mode<synchronous>, transform_indices = @transform_21, window_bounds = array<i64: 32, 5>}, {pipeline_mode = #tpu.pipeline_mode<synchronous>, transform_indices = @transform_22, window_bounds = array<i64: 1, 5>}, {transform_indices = @transform_23, window_bounds = array<i64: 1, 9, 32>}, {transform_indices = @transform_24, window_bounds = array<i64: 1, 1, 5>}]} {
    %c0_i32 = arith.constant 0 : i32
    %0 = arith.cmpi eq, %arg1, %c0_i32 : i32
    %1 = arith.extui %0 : i1 to i32
    %c0_i32_0 = arith.constant 0 : i32
    %2 = arith.cmpi ne, %1, %c0_i32_0 : i32
    scf.if %2 {
      %c0_83 = arith.constant 0 : index
      %c0_84 = arith.constant 0 : index
      %c0_85 = arith.constant 0 : index
      %169 = vector.load %arg2[%c0_83, %c0_84, %c0_85] : memref<1x9x16xbf16, #tpu.memory_space<vmem>>, vector<1x9x16xbf16>
      %170 = vector.shape_cast %169 : vector<1x9x16xbf16> to vector<9x16xbf16>
      %c0_86 = arith.constant 0 : index
      %c0_87 = arith.constant 0 : index
      %171 = vector.load %arg4[%c0_86, %c0_87] : memref<16x32xbf16, #tpu.memory_space<vmem>>, vector<16x32xbf16>
      %cst_88 = arith.constant dense<0.000000e+00> : vector<9x32xf32>
      %172 = tpu.matmul %170, %171, %cst_88 {dimension_numbers = #tpu.dot_dimension_numbers<[1], [0], [0], [1], [0, 0, 1, 1], [], []>} : vector<9x16xbf16>, vector<16x32xbf16>, vector<9x32xf32> -> vector<9x32xf32>
      %c0_89 = arith.constant 0 : index
      %c0_90 = arith.constant 0 : index
      %173 = vector.load %arg5[%c0_89, %c0_90] : memref<9x32xf32, #tpu.memory_space<vmem>>, vector<9x32xf32>
      %174 = arith.addf %172, %173 : vector<9x32xf32>
      %c0_91 = arith.constant 0 : index
      %c0_92 = arith.constant 0 : index
      %175 = vector.load %arg27[%c0_91, %c0_92] : memref<9x32xf32, #tpu.memory_space<vmem>>, vector<9x32xf32>
      tpu.vector_store %arg27[%c0_91, %c0_92], %174 {strides = array<i32>} : memref<9x32xf32, #tpu.memory_space<vmem>>, vector<9x32xf32>,
    } else {
    }
    %c0 = arith.constant 0 : index
    %c0_1 = arith.constant 0 : index
    %3 = vector.load %arg27[%c0, %c0_1] : memref<9x32xf32, #tpu.memory_space<vmem>>, vector<9x32xf32>
    %c0_2 = arith.constant 0 : index
    %c0_3 = arith.constant 0 : index
    %c0_4 = arith.constant 0 : index
    %4 = vector.load %arg3[%c0_2, %c0_3, %c0_4] : memref<1x9x32xf32, #tpu.memory_space<vmem>>, vector<1x9x32xf32>
    %5 = vector.shape_cast %4 : vector<1x9x32xf32> to vector<9x32xf32>
    %c0_5 = arith.constant 0 : index
    %c0_6 = arith.constant 0 : index
    %c0_7 = arith.constant 0 : index
    %6 = vector.load %arg6[%c0_5, %c0_6, %c0_7] : memref<1x1x32xf32, #tpu.memory_space<vmem>>, vector<1x1x32xf32>
    %7 = vector.shape_cast %6 : vector<1x1x32xf32> to vector<1x32xf32>
    %c0_8 = arith.constant 0 : index
    %c0_9 = arith.constant 0 : index
    %c0_10 = arith.constant 0 : index
    %8 = vector.load %arg7[%c0_8, %c0_9, %c0_10] : memref<1x1x32xf32, #tpu.memory_space<vmem>>, vector<1x1x32xf32>
    %9 = vector.shape_cast %8 : vector<1x1x32xf32> to vector<1x32xf32>
    %cst = arith.constant dense<0.000000e+00> : vector<9xf32>
    %10 = vector.multi_reduction <add>, %3, %cst [1] : vector<9x32xf32> to vector<9xf32>
    %11 = vector.shape_cast %10 : vector<9xf32> to vector<9x1xf32>
    %cst_11 = arith.constant 3.200000e+01 : f32
    %12 = vector.broadcast %cst_11 : f32 to vector<9x1xf32>
    %13 = arith.divf %11, %12 : vector<9x1xf32>
    %14 = vector.broadcast %13 : vector<9x1xf32> to vector<9x32xf32>
    %15 = arith.subf %3, %14 : vector<9x32xf32>
    %16 = arith.mulf %15, %15 : vector<9x32xf32>
    %cst_12 = arith.constant dense<0.000000e+00> : vector<9xf32>
    %17 = vector.multi_reduction <add>, %16, %cst_12 [1] : vector<9x32xf32> to vector<9xf32>
    %18 = vector.shape_cast %17 : vector<9xf32> to vector<9x1xf32>
    %cst_13 = arith.constant 3.200000e+01 : f32
    %19 = vector.broadcast %cst_13 : f32 to vector<9x1xf32>
    %20 = arith.divf %18, %19 : vector<9x1xf32>
    %21 = vector.broadcast %13 : vector<9x1xf32> to vector<9x32xf32>
    %22 = arith.subf %3, %21 : vector<9x32xf32>
    %cst_14 = arith.constant 9.99999974E-6 : f32
    %23 = vector.broadcast %cst_14 : f32 to vector<9x1xf32>
    %24 = arith.addf %20, %23 : vector<9x1xf32>
    %25 = math.rsqrt %24 : vector<9x1xf32>
    %26 = vector.broadcast %25 : vector<9x1xf32> to vector<9x32xf32>
    %27 = arith.mulf %22, %26 : vector<9x32xf32>
    %28 = vector.broadcast %7 : vector<1x32xf32> to vector<9x32xf32>
    %29 = arith.mulf %27, %28 : vector<9x32xf32>
    %30 = vector.broadcast %9 : vector<1x32xf32> to vector<9x32xf32>
    %31 = arith.addf %29, %30 : vector<9x32xf32>
    %32 = arith.truncf %31 : vector<9x32xf32> to vector<9x32xbf16>
    %33 = arith.truncf %5 : vector<9x32xf32> to vector<9x32xbf16>
    %c0_15 = arith.constant 0 : index
    %c0_16 = arith.constant 0 : index
    %c0_17 = arith.constant 0 : index
    %34 = vector.load %arg8[%c0_15, %c0_16, %c0_17] : memref<1x32x16xbf16, #tpu.memory_space<vmem>>, vector<1x32x16xbf16>
    %35 = vector.shape_cast %34 : vector<1x32x16xbf16> to vector<32x16xbf16>
    %c0_18 = arith.constant 0 : index
    %c0_19 = arith.constant 0 : index
    %c0_20 = arith.constant 0 : index
    %36 = vector.load %arg9[%c0_18, %c0_19, %c0_20] : memref<1x1x16xf32, #tpu.memory_space<vmem>>, vector<1x1x16xf32>
    %37 = vector.shape_cast %36 : vector<1x1x16xf32> to vector<1x16xf32>
    %cst_21 = arith.constant dense<0.000000e+00> : vector<9x16xf32>
    %38 = tpu.matmul %32, %35, %cst_21 {dimension_numbers = #tpu.dot_dimension_numbers<[1], [0], [0], [1], [0, 0, 1, 1], [], []>} : vector<9x32xbf16>, vector<32x16xbf16>, vector<9x16xf32> -> vector<9x16xf32>
    %39 = vector.broadcast %37 : vector<1x16xf32> to vector<9x16xf32>
    %40 = arith.addf %38, %39 : vector<9x16xf32>
    %cst_22 = arith.constant dense<0.000000e+00> : vector<9x16xf32>
    %41 = tpu.matmul %33, %35, %cst_22 {dimension_numbers = #tpu.dot_dimension_numbers<[1], [0], [0], [1], [0, 0, 1, 1], [], []>} : vector<9x32xbf16>, vector<32x16xbf16>, vector<9x16xf32> -> vector<9x16xf32>
    %42 = vector.broadcast %37 : vector<1x16xf32> to vector<9x16xf32>
    %43 = arith.addf %41, %42 : vector<9x16xf32>
    %c0_23 = arith.constant 0 : index
    %c0_24 = arith.constant 0 : index
    %c0_25 = arith.constant 0 : index
    %44 = vector.load %arg10[%c0_23, %c0_24, %c0_25] : memref<1x32x32xbf16, #tpu.memory_space<vmem>>, vector<1x32x32xbf16>
    %45 = vector.shape_cast %44 : vector<1x32x32xbf16> to vector<32x32xbf16>
    %cst_26 = arith.constant dense<0.000000e+00> : vector<9x32xf32>
    %46 = tpu.matmul %32, %45, %cst_26 {dimension_numbers = #tpu.dot_dimension_numbers<[1], [0], [0], [1], [0, 0, 1, 1], [], []>} : vector<9x32xbf16>, vector<32x32xbf16>, vector<9x32xf32> -> vector<9x32xf32>
    %c0_27 = arith.constant 0 : index
    %c0_28 = arith.constant 0 : index
    %c0_29 = arith.constant 0 : index
    %47 = vector.load %arg11[%c0_27, %c0_28, %c0_29] : memref<1x32x32xbf16, #tpu.memory_space<vmem>>, vector<1x32x32xbf16>
    %48 = vector.shape_cast %47 : vector<1x32x32xbf16> to vector<32x32xbf16>
    %cst_30 = arith.constant dense<0.000000e+00> : vector<9x32xf32>
    %49 = tpu.matmul %32, %48, %cst_30 {dimension_numbers = #tpu.dot_dimension_numbers<[1], [0], [0], [1], [0, 0, 1, 1], [], []>} : vector<9x32xbf16>, vector<32x32xbf16>, vector<9x32xf32> -> vector<9x32xf32>
    %c0_31 = arith.constant 0 : index
    %c0_32 = arith.constant 0 : index
    %c0_33 = arith.constant 0 : index
    %50 = vector.load %arg12[%c0_31, %c0_32, %c0_33] : memref<1x32x32xbf16, #tpu.memory_space<vmem>>, vector<1x32x32xbf16>
    %51 = vector.shape_cast %50 : vector<1x32x32xbf16> to vector<32x32xbf16>
    %cst_34 = arith.constant dense<0.000000e+00> : vector<9x32xf32>
    %52 = tpu.matmul %32, %51, %cst_34 {dimension_numbers = #tpu.dot_dimension_numbers<[1], [0], [0], [1], [0, 0, 1, 1], [], []>} : vector<9x32xbf16>, vector<32x32xbf16>, vector<9x32xf32> -> vector<9x32xf32>
    %cst_35 = arith.constant 2.500000e-01 : f32
    %53 = vector.broadcast %cst_35 : f32 to vector<9x16xf32>
    %54 = arith.mulf %40, %53 : vector<9x16xf32>
    %c0_36 = arith.constant 0 : index
    %c0_37 = arith.constant 0 : index
    %c0_38 = arith.constant 0 : index
    %55 = vector.load %arg13[%c0_36, %c0_37, %c0_38] : memref<1x32x32xbf16, #tpu.memory_space<vmem>>, vector<1x32x32xbf16>
    %56 = vector.shape_cast %55 : vector<1x32x32xbf16> to vector<32x32xbf16>
    %57 = vector.extract_strided_slice %46 {offsets = [0, 0], sizes = [9, 16], strides = [1, 1]} : vector<9x32xf32> to vector<9x16xf32>
    %58 = arith.mulf %57, %54 : vector<9x16xf32>
    %59 = arith.truncf %58 : vector<9x16xf32> to vector<9x16xbf16>
    %60 = vector.extract_strided_slice %49 {offsets = [0, 0], sizes = [9, 16], strides = [1, 1]} : vector<9x32xf32> to vector<9x16xf32>
    %61 = arith.mulf %60, %43 : vector<9x16xf32>
    %62 = arith.truncf %61 : vector<9x16xf32> to vector<9x16xbf16>
    %63 = vector.extract_strided_slice %52 {offsets = [0, 0], sizes = [9, 16], strides = [1, 1]} : vector<9x32xf32> to vector<9x16xf32>
    %64 = arith.mulf %63, %43 : vector<9x16xf32>
    %65 = arith.truncf %64 : vector<9x16xf32> to vector<9x16xbf16>
    %cst_39 = arith.constant dense<0.000000e+00> : vector<9x9xf32>
    %66 = tpu.matmul %59, %62, %cst_39 {dimension_numbers = #tpu.dot_dimension_numbers<[1], [1], [0], [0], [0, 0, 1, 0], [], []>} : vector<9x16xbf16>, vector<9x16xbf16>, vector<9x9xf32> -> vector<9x9xf32>
    %cst_40 = arith.constant dense<0xFF800000> : vector<9xf32>
    %67 = vector.multi_reduction <maximumf>, %66, %cst_40 [1] : vector<9x9xf32> to vector<9xf32>
    %68 = vector.shape_cast %67 : vector<9xf32> to vector<9x1xf32>
    %69 = vector.broadcast %68 : vector<9x1xf32> to vector<9x9xf32>
    %70 = arith.subf %66, %69 : vector<9x9xf32>
    %71 = math.exp %70 : vector<9x9xf32>
    %cst_41 = arith.constant dense<0.000000e+00> : vector<9xf32>
    %72 = vector.multi_reduction <add>, %71, %cst_41 [1] : vector<9x9xf32> to vector<9xf32>
    %73 = vector.shape_cast %72 : vector<9xf32> to vector<9x1xf32>
    %74 = tpu.reciprocal %73 {approx = true} : vector<9x1xf32> -> vector<9x1xf32>
    %75 = vector.broadcast %74 : vector<9x1xf32> to vector<9x9xf32>
    %76 = arith.mulf %71, %75 : vector<9x9xf32>
    %77 = arith.truncf %76 : vector<9x9xf32> to vector<9x9xbf16>
    %cst_42 = arith.constant dense<0.000000e+00> : vector<9x16xf32>
    %78 = tpu.matmul %77, %65, %cst_42 {dimension_numbers = #tpu.dot_dimension_numbers<[1], [0], [0], [1], [0, 0, 1, 1], [], []>} : vector<9x9xbf16>, vector<9x16xbf16>, vector<9x16xf32> -> vector<9x16xf32>
    %79 = arith.truncf %78 : vector<9x16xf32> to vector<9x16xbf16>
    %80 = vector.extract_strided_slice %56 {offsets = [0, 0], sizes = [16, 32], strides = [1, 1]} : vector<32x32xbf16> to vector<16x32xbf16>
    %cst_43 = arith.constant dense<0.000000e+00> : vector<9x32xf32>
    %81 = tpu.matmul %79, %80, %cst_43 {dimension_numbers = #tpu.dot_dimension_numbers<[1], [0], [0], [1], [0, 0, 1, 1], [], []>} : vector<9x16xbf16>, vector<16x32xbf16>, vector<9x32xf32> -> vector<9x32xf32>
    %82 = vector.extract_strided_slice %46 {offsets = [0, 16], sizes = [9, 16], strides = [1, 1]} : vector<9x32xf32> to vector<9x16xf32>
    %83 = arith.mulf %82, %54 : vector<9x16xf32>
    %84 = arith.truncf %83 : vector<9x16xf32> to vector<9x16xbf16>
    %85 = vector.extract_strided_slice %49 {offsets = [0, 16], sizes = [9, 16], strides = [1, 1]} : vector<9x32xf32> to vector<9x16xf32>
    %86 = arith.mulf %85, %43 : vector<9x16xf32>
    %87 = arith.truncf %86 : vector<9x16xf32> to vector<9x16xbf16>
    %88 = vector.extract_strided_slice %52 {offsets = [0, 16], sizes = [9, 16], strides = [1, 1]} : vector<9x32xf32> to vector<9x16xf32>
    %89 = arith.mulf %88, %43 : vector<9x16xf32>
    %90 = arith.truncf %89 : vector<9x16xf32> to vector<9x16xbf16>
    %cst_44 = arith.constant dense<0.000000e+00> : vector<9x9xf32>
    %91 = tpu.matmul %84, %87, %cst_44 {dimension_numbers = #tpu.dot_dimension_numbers<[1], [1], [0], [0], [0, 0, 1, 0], [], []>} : vector<9x16xbf16>, vector<9x16xbf16>, vector<9x9xf32> -> vector<9x9xf32>
    %cst_45 = arith.constant dense<0xFF800000> : vector<9xf32>
    %92 = vector.multi_reduction <maximumf>, %91, %cst_45 [1] : vector<9x9xf32> to vector<9xf32>
    %93 = vector.shape_cast %92 : vector<9xf32> to vector<9x1xf32>
    %94 = vector.broadcast %93 : vector<9x1xf32> to vector<9x9xf32>
    %95 = arith.subf %91, %94 : vector<9x9xf32>
    %96 = math.exp %95 : vector<9x9xf32>
    %cst_46 = arith.constant dense<0.000000e+00> : vector<9xf32>
    %97 = vector.multi_reduction <add>, %96, %cst_46 [1] : vector<9x9xf32> to vector<9xf32>
    %98 = vector.shape_cast %97 : vector<9xf32> to vector<9x1xf32>
    %99 = tpu.reciprocal %98 {approx = true} : vector<9x1xf32> -> vector<9x1xf32>
    %100 = vector.broadcast %99 : vector<9x1xf32> to vector<9x9xf32>
    %101 = arith.mulf %96, %100 : vector<9x9xf32>
    %102 = arith.truncf %101 : vector<9x9xf32> to vector<9x9xbf16>
    %cst_47 = arith.constant dense<0.000000e+00> : vector<9x16xf32>
    %103 = tpu.matmul %102, %90, %cst_47 {dimension_numbers = #tpu.dot_dimension_numbers<[1], [0], [0], [1], [0, 0, 1, 1], [], []>} : vector<9x9xbf16>, vector<9x16xbf16>, vector<9x16xf32> -> vector<9x16xf32>
    %104 = arith.truncf %103 : vector<9x16xf32> to vector<9x16xbf16>
    %105 = vector.extract_strided_slice %56 {offsets = [16, 0], sizes = [16, 32], strides = [1, 1]} : vector<32x32xbf16> to vector<16x32xbf16>
    %cst_48 = arith.constant dense<0.000000e+00> : vector<9x32xf32>
    %106 = tpu.matmul %104, %105, %cst_48 {dimension_numbers = #tpu.dot_dimension_numbers<[1], [0], [0], [1], [0, 0, 1, 1], [], []>} : vector<9x16xbf16>, vector<16x32xbf16>, vector<9x32xf32> -> vector<9x32xf32>
    %107 = arith.addf %81, %106 : vector<9x32xf32>
    %c0_49 = arith.constant 0 : index
    %c0_50 = arith.constant 0 : index
    %c0_51 = arith.constant 0 : index
    %108 = vector.load %arg14[%c0_49, %c0_50, %c0_51] : memref<1x1x32xf32, #tpu.memory_space<vmem>>, vector<1x1x32xf32>
    %109 = vector.shape_cast %108 : vector<1x1x32xf32> to vector<1x32xf32>
    %110 = vector.broadcast %109 : vector<1x32xf32> to vector<9x32xf32>
    %111 = arith.addf %107, %110 : vector<9x32xf32>
    %112 = arith.addf %111, %3 : vector<9x32xf32>
    %113 = arith.addf %112, %5 : vector<9x32xf32>
    %c0_52 = arith.constant 0 : index
    %c0_53 = arith.constant 0 : index
    %c0_54 = arith.constant 0 : index
    %114 = vector.load %arg15[%c0_52, %c0_53, %c0_54] : memref<1x1x32xf32, #tpu.memory_space<vmem>>, vector<1x1x32xf32>
    %115 = vector.shape_cast %114 : vector<1x1x32xf32> to vector<1x32xf32>
    %c0_55 = arith.constant 0 : index
    %c0_56 = arith.constant 0 : index
    %c0_57 = arith.constant 0 : index
    %116 = vector.load %arg16[%c0_55, %c0_56, %c0_57] : memref<1x1x32xf32, #tpu.memory_space<vmem>>, vector<1x1x32xf32>
    %117 = vector.shape_cast %116 : vector<1x1x32xf32> to vector<1x32xf32>
    %cst_58 = arith.constant dense<0.000000e+00> : vector<9xf32>
    %118 = vector.multi_reduction <add>, %113, %cst_58 [1] : vector<9x32xf32> to vector<9xf32>
    %119 = vector.shape_cast %118 : vector<9xf32> to vector<9x1xf32>
    %cst_59 = arith.constant 3.200000e+01 : f32
    %120 = vector.broadcast %cst_59 : f32 to vector<9x1xf32>
    %121 = arith.divf %119, %120 : vector<9x1xf32>
    %122 = vector.broadcast %121 : vector<9x1xf32> to vector<9x32xf32>
    %123 = arith.subf %113, %122 : vector<9x32xf32>
    %124 = arith.mulf %123, %123 : vector<9x32xf32>
    %cst_60 = arith.constant dense<0.000000e+00> : vector<9xf32>
    %125 = vector.multi_reduction <add>, %124, %cst_60 [1] : vector<9x32xf32> to vector<9xf32>
    %126 = vector.shape_cast %125 : vector<9xf32> to vector<9x1xf32>
    %cst_61 = arith.constant 3.200000e+01 : f32
    %127 = vector.broadcast %cst_61 : f32 to vector<9x1xf32>
    %128 = arith.divf %126, %127 : vector<9x1xf32>
    %129 = vector.broadcast %121 : vector<9x1xf32> to vector<9x32xf32>
    %130 = arith.subf %113, %129 : vector<9x32xf32>
    %cst_62 = arith.constant 9.99999974E-6 : f32
    %131 = vector.broadcast %cst_62 : f32 to vector<9x1xf32>
    %132 = arith.addf %128, %131 : vector<9x1xf32>
    %133 = math.rsqrt %132 : vector<9x1xf32>
    %134 = vector.broadcast %133 : vector<9x1xf32> to vector<9x32xf32>
    %135 = arith.mulf %130, %134 : vector<9x32xf32>
    %136 = vector.broadcast %115 : vector<1x32xf32> to vector<9x32xf32>
    %137 = arith.mulf %135, %136 : vector<9x32xf32>
    %138 = vector.broadcast %117 : vector<1x32xf32> to vector<9x32xf32>
    %139 = arith.addf %137, %138 : vector<9x32xf32>
    %140 = arith.truncf %139 : vector<9x32xf32> to vector<9x32xbf16>
    %c0_63 = arith.constant 0 : index
    %c0_64 = arith.constant 0 : index
    %c0_65 = arith.constant 0 : index
    %141 = vector.load %arg17[%c0_63, %c0_64, %c0_65] : memref<1x32x64xbf16, #tpu.memory_space<vmem>>, vector<1x32x64xbf16>
    %142 = vector.shape_cast %141 : vector<1x32x64xbf16> to vector<32x64xbf16>
    %cst_66 = arith.constant dense<0.000000e+00> : vector<9x64xf32>
    %143 = tpu.matmul %140, %142, %cst_66 {dimension_numbers = #tpu.dot_dimension_numbers<[1], [0], [0], [1], [0, 0, 1, 1], [], []>} : vector<9x32xbf16>, vector<32x64xbf16>, vector<9x64xf32> -> vector<9x64xf32>
    %c0_67 = arith.constant 0 : index
    %c0_68 = arith.constant 0 : index
    %c0_69 = arith.constant 0 : index
    %144 = vector.load %arg18[%c0_67, %c0_68, %c0_69] : memref<1x1x64xf32, #tpu.memory_space<vmem>>, vector<1x1x64xf32>
    %145 = vector.shape_cast %144 : vector<1x1x64xf32> to vector<1x64xf32>
    %146 = vector.broadcast %145 : vector<1x64xf32> to vector<9x64xf32>
    %147 = arith.addf %143, %146 : vector<9x64xf32>
    %cst_70 = arith.constant 5.000000e-01 : f32
    %148 = vector.broadcast %cst_70 : f32 to vector<9x64xf32>
    %149 = arith.mulf %148, %147 : vector<9x64xf32>
    %cst_71 = arith.constant 0.707106769 : f32
    %150 = vector.broadcast %cst_71 : f32 to vector<9x64xf32>
    %151 = arith.mulf %147, %150 : vector<9x64xf32>
    %152 = math.erf %151 : vector<9x64xf32>
    %cst_72 = arith.constant 1.000000e+00 : f32
    %153 = vector.broadcast %cst_72 : f32 to vector<9x64xf32>
    %154 = arith.addf %153, %152 : vector<9x64xf32>
    %155 = arith.mulf %149, %154 : vector<9x64xf32>
    %156 = arith.truncf %155 : vector<9x64xf32> to vector<9x64xbf16>
    %c0_73 = arith.constant 0 : index
    %c0_74 = arith.constant 0 : index
    %c0_75 = arith.constant 0 : index
    %157 = vector.load %arg19[%c0_73, %c0_74, %c0_75] : memref<1x64x32xbf16, #tpu.memory_space<vmem>>, vector<1x64x32xbf16>
    %158 = vector.shape_cast %157 : vector<1x64x32xbf16> to vector<64x32xbf16>
    %cst_76 = arith.constant dense<0.000000e+00> : vector<9x32xf32>
    %159 = tpu.matmul %156, %158, %cst_76 {dimension_numbers = #tpu.dot_dimension_numbers<[1], [0], [0], [1], [0, 0, 1, 1], [], []>} : vector<9x64xbf16>, vector<64x32xbf16>, vector<9x32xf32> -> vector<9x32xf32>
    %c0_77 = arith.constant 0 : index
    %c0_78 = arith.constant 0 : index
    %c0_79 = arith.constant 0 : index
    %160 = vector.load %arg20[%c0_77, %c0_78, %c0_79] : memref<1x1x32xf32, #tpu.memory_space<vmem>>, vector<1x1x32xf32>
    %161 = vector.shape_cast %160 : vector<1x1x32xf32> to vector<1x32xf32>
    %162 = vector.broadcast %161 : vector<1x32xf32> to vector<9x32xf32>
    %163 = arith.addf %159, %162 : vector<9x32xf32>
    %164 = arith.addf %113, %163 : vector<9x32xf32>
    %c0_80 = arith.constant 0 : index
    %c0_81 = arith.constant 0 : index
    %165 = vector.load %arg27[%c0_80, %c0_81] : memref<9x32xf32, #tpu.memory_space<vmem>>, vector<9x32xf32>
    tpu.vector_store %arg27[%c0_80, %c0_81], %164 {strides = array<i32>} : memref<9x32xf32, #tpu.memory_space<vmem>>, vector<9x32xf32>,
    %c1_i32 = arith.constant 1 : i32
    %166 = arith.cmpi eq, %arg1, %c1_i32 : i32
    %167 = arith.extui %166 : i1 to i32
    %c0_i32_82 = arith.constant 0 : i32
    %168 = arith.cmpi ne, %167, %c0_i32_82 : i32
    scf.if %168 {
      %c0_83 = arith.constant 0 : index
      %c0_84 = arith.constant 0 : index
      %c0_85 = arith.constant 0 : index
      %169 = vector.load %arg25[%c0_83, %c0_84, %c0_85] : memref<1x9x32xf32, #tpu.memory_space<vmem>>, vector<1x9x32xf32>
      %170 = vector.shape_cast %169 : vector<1x9x32xf32> to vector<9x32xf32>
      %171 = vector.shape_cast %164 : vector<9x32xf32> to vector<1x9x32xf32>
      tpu.vector_store %arg25[%c0_83, %c0_84, %c0_85], %171 {strides = array<i32>} : memref<1x9x32xf32, #tpu.memory_space<vmem>>, vector<1x9x32xf32>,
      %172 = vector.extract_strided_slice %164 {offsets = [0, 0], sizes = [1, 32], strides = [1, 1]} : vector<9x32xf32> to vector<1x32xf32>
      %c0_86 = arith.constant 0 : index
      %c0_87 = arith.constant 0 : index
      %173 = vector.load %arg21[%c0_86, %c0_87] : memref<1x32xf32, #tpu.memory_space<vmem>>, vector<1x32xf32>
      %c0_88 = arith.constant 0 : index
      %c0_89 = arith.constant 0 : index
      %174 = vector.load %arg22[%c0_88, %c0_89] : memref<1x32xf32, #tpu.memory_space<vmem>>, vector<1x32xf32>
      %cst_90 = arith.constant dense<0.000000e+00> : vector<1xf32>
      %175 = vector.multi_reduction <add>, %172, %cst_90 [1] : vector<1x32xf32> to vector<1xf32>
      %176 = vector.shape_cast %175 : vector<1xf32> to vector<1x1xf32>
      %cst_91 = arith.constant 3.200000e+01 : f32
      %177 = vector.broadcast %cst_91 : f32 to vector<1x1xf32>
      %178 = arith.divf %176, %177 : vector<1x1xf32>
      %179 = vector.broadcast %178 : vector<1x1xf32> to vector<1x32xf32>
      %180 = arith.subf %172, %179 : vector<1x32xf32>
      %181 = arith.mulf %180, %180 : vector<1x32xf32>
      %cst_92 = arith.constant dense<0.000000e+00> : vector<1xf32>
      %182 = vector.multi_reduction <add>, %181, %cst_92 [1] : vector<1x32xf32> to vector<1xf32>
      %183 = vector.shape_cast %182 : vector<1xf32> to vector<1x1xf32>
      %cst_93 = arith.constant 3.200000e+01 : f32
      %184 = vector.broadcast %cst_93 : f32 to vector<1x1xf32>
      %185 = arith.divf %183, %184 : vector<1x1xf32>
      %186 = vector.broadcast %178 : vector<1x1xf32> to vector<1x32xf32>
      %187 = arith.subf %172, %186 : vector<1x32xf32>
      %cst_94 = arith.constant 9.99999974E-6 : f32
      %188 = vector.broadcast %cst_94 : f32 to vector<1x1xf32>
      %189 = arith.addf %185, %188 : vector<1x1xf32>
      %190 = math.rsqrt %189 : vector<1x1xf32>
      %191 = vector.broadcast %190 : vector<1x1xf32> to vector<1x32xf32>
      %192 = arith.mulf %187, %191 : vector<1x32xf32>
      %193 = arith.mulf %192, %173 : vector<1x32xf32>
      %194 = arith.addf %193, %174 : vector<1x32xf32>
      %195 = arith.truncf %194 : vector<1x32xf32> to vector<1x32xbf16>
      %c0_95 = arith.constant 0 : index
      %c0_96 = arith.constant 0 : index
      %196 = vector.load %arg23[%c0_95, %c0_96] : memref<32x5xbf16, #tpu.memory_space<vmem>>, vector<32x5xbf16>
      %cst_97 = arith.constant dense<0.000000e+00> : vector<1x5xf32>
      %197 = tpu.matmul %195, %196, %cst_97 {dimension_numbers = #tpu.dot_dimension_numbers<[1], [0], [0], [1], [0, 0, 1, 1], [], []>} : vector<1x32xbf16>, vector<32x5xbf16>, vector<1x5xf32> -> vector<1x5xf32>
      %c0_98 = arith.constant 0 : index
      %c0_99 = arith.constant 0 : index
      %198 = vector.load %arg24[%c0_98, %c0_99] : memref<1x5xf32, #tpu.memory_space<vmem>>, vector<1x5xf32>
      %199 = arith.addf %197, %198 : vector<1x5xf32>
      %c0_100 = arith.constant 0 : index
      %c0_101 = arith.constant 0 : index
      %c0_102 = arith.constant 0 : index
      %200 = vector.load %arg26[%c0_100, %c0_101, %c0_102] : memref<1x1x5xf32, #tpu.memory_space<vmem>>, vector<1x1x5xf32>
      %201 = vector.shape_cast %200 : vector<1x1x5xf32> to vector<1x5xf32>
      %202 = vector.shape_cast %199 : vector<1x5xf32> to vector<1x1x5xf32>
      tpu.vector_store %arg26[%c0_100, %c0_101, %c0_102], %202 {strides = array<i32>} : memref<1x1x5xf32, #tpu.memory_space<vmem>>, vector<1x1x5xf32>,
    } else {
    }
    return
  }
  func.func @transform_0(%arg0: i32, %arg1: i32) -> (i32, i32, i32) {
    %c0_i32 = arith.constant 0 : i32
    %c0_i32_0 = arith.constant 0 : i32
    %c0_i32_1 = arith.constant 0 : i32
    return %arg0, %c0_i32, %c0_i32_0 : i32, i32, i32
  }
  func.func @transform_1(%arg0: i32, %arg1: i32) -> (i32, i32, i32) {
    %c0_i32 = arith.constant 0 : i32
    %c0_i32_0 = arith.constant 0 : i32
    %c0_i32_1 = arith.constant 0 : i32
    return %arg0, %c0_i32, %c0_i32_0 : i32, i32, i32
  }
  func.func @transform_2(%arg0: i32, %arg1: i32) -> (i32, i32) {
    %c0_i32 = arith.constant 0 : i32
    %c0_i32_0 = arith.constant 0 : i32
    %c0_i32_1 = arith.constant 0 : i32
    return %c0_i32, %c0_i32_0 : i32, i32
  }
  func.func @transform_3(%arg0: i32, %arg1: i32) -> (i32, i32) {
    %c0_i32 = arith.constant 0 : i32
    %c0_i32_0 = arith.constant 0 : i32
    %c0_i32_1 = arith.constant 0 : i32
    return %c0_i32, %c0_i32_0 : i32, i32
  }
  func.func @transform_4(%arg0: i32, %arg1: i32) -> (i32, i32, i32) {
    %c0_i32 = arith.constant 0 : i32
    %c0_i32_0 = arith.constant 0 : i32
    %c0_i32_1 = arith.constant 0 : i32
    return %arg1, %c0_i32, %c0_i32_0 : i32, i32, i32
  }
  func.func @transform_5(%arg0: i32, %arg1: i32) -> (i32, i32, i32) {
    %c0_i32 = arith.constant 0 : i32
    %c0_i32_0 = arith.constant 0 : i32
    %c0_i32_1 = arith.constant 0 : i32
    return %arg1, %c0_i32, %c0_i32_0 : i32, i32, i32
  }
  func.func @transform_6(%arg0: i32, %arg1: i32) -> (i32, i32, i32) {
    %c0_i32 = arith.constant 0 : i32
    %c0_i32_0 = arith.constant 0 : i32
    %c0_i32_1 = arith.constant 0 : i32
    return %arg1, %c0_i32, %c0_i32_0 : i32, i32, i32
  }
  func.func @transform_7(%arg0: i32, %arg1: i32) -> (i32, i32, i32) {
    %c0_i32 = arith.constant 0 : i32
    %c0_i32_0 = arith.constant 0 : i32
    %c0_i32_1 = arith.constant 0 : i32
    return %arg1, %c0_i32, %c0_i32_0 : i32, i32, i32
  }
  func.func @transform_8(%arg0: i32, %arg1: i32) -> (i32, i32, i32) {
    %c0_i32 = arith.constant 0 : i32
    %c0_i32_0 = arith.constant 0 : i32
    %c0_i32_1 = arith.constant 0 : i32
    return %arg1, %c0_i32, %c0_i32_0 : i32, i32, i32
  }
  func.func @transform_9(%arg0: i32, %arg1: i32) -> (i32, i32, i32) {
    %c0_i32 = arith.constant 0 : i32
    %c0_i32_0 = arith.constant 0 : i32
    %c0_i32_1 = arith.constant 0 : i32
    return %arg1, %c0_i32, %c0_i32_0 : i32, i32, i32
  }
  func.func @transform_10(%arg0: i32, %arg1: i32) -> (i32, i32, i32) {
    %c0_i32 = arith.constant 0 : i32
    %c0_i32_0 = arith.constant 0 : i32
    %c0_i32_1 = arith.constant 0 : i32
    return %arg1, %c0_i32, %c0_i32_0 : i32, i32, i32
  }
  func.func @transform_11(%arg0: i32, %arg1: i32) -> (i32, i32, i32) {
    %c0_i32 = arith.constant 0 : i32
    %c0_i32_0 = arith.constant 0 : i32
    %c0_i32_1 = arith.constant 0 : i32
    return %arg1, %c0_i32, %c0_i32_0 : i32, i32, i32
  }
  func.func @transform_12(%arg0: i32, %arg1: i32) -> (i32, i32, i32) {
    %c0_i32 = arith.constant 0 : i32
    %c0_i32_0 = arith.constant 0 : i32
    %c0_i32_1 = arith.constant 0 : i32
    return %arg1, %c0_i32, %c0_i32_0 : i32, i32, i32
  }
  func.func @transform_13(%arg0: i32, %arg1: i32) -> (i32, i32, i32) {
    %c0_i32 = arith.constant 0 : i32
    %c0_i32_0 = arith.constant 0 : i32
    %c0_i32_1 = arith.constant 0 : i32
    return %arg1, %c0_i32, %c0_i32_0 : i32, i32, i32
  }
  func.func @transform_14(%arg0: i32, %arg1: i32) -> (i32, i32, i32) {
    %c0_i32 = arith.constant 0 : i32
    %c0_i32_0 = arith.constant 0 : i32
    %c0_i32_1 = arith.constant 0 : i32
    return %arg1, %c0_i32, %c0_i32_0 : i32, i32, i32
  }
  func.func @transform_15(%arg0: i32, %arg1: i32) -> (i32, i32, i32) {
    %c0_i32 = arith.constant 0 : i32
    %c0_i32_0 = arith.constant 0 : i32
    %c0_i32_1 = arith.constant 0 : i32
    return %arg1, %c0_i32, %c0_i32_0 : i32, i32, i32
  }
  func.func @transform_16(%arg0: i32, %arg1: i32) -> (i32, i32, i32) {
    %c0_i32 = arith.constant 0 : i32
    %c0_i32_0 = arith.constant 0 : i32
    %c0_i32_1 = arith.constant 0 : i32
    return %arg1, %c0_i32, %c0_i32_0 : i32, i32, i32
  }
  func.func @transform_17(%arg0: i32, %arg1: i32) -> (i32, i32, i32) {
    %c0_i32 = arith.constant 0 : i32
    %c0_i32_0 = arith.constant 0 : i32
    %c0_i32_1 = arith.constant 0 : i32
    return %arg1, %c0_i32, %c0_i32_0 : i32, i32, i32
  }
  func.func @transform_18(%arg0: i32, %arg1: i32) -> (i32, i32, i32) {
    %c0_i32 = arith.constant 0 : i32
    %c0_i32_0 = arith.constant 0 : i32
    %c0_i32_1 = arith.constant 0 : i32
    return %arg1, %c0_i32, %c0_i32_0 : i32, i32, i32
  }
  func.func @transform_19(%arg0: i32, %arg1: i32) -> (i32, i32) {
    %c0_i32 = arith.constant 0 : i32
    %c0_i32_0 = arith.constant 0 : i32
    %c0_i32_1 = arith.constant 0 : i32
    return %c0_i32, %c0_i32_0 : i32, i32
  }
  func.func @transform_20(%arg0: i32, %arg1: i32) -> (i32, i32) {
    %c0_i32 = arith.constant 0 : i32
    %c0_i32_0 = arith.constant 0 : i32
    %c0_i32_1 = arith.constant 0 : i32
    return %c0_i32, %c0_i32_0 : i32, i32
  }
  func.func @transform_21(%arg0: i32, %arg1: i32) -> (i32, i32) {
    %c0_i32 = arith.constant 0 : i32
    %c0_i32_0 = arith.constant 0 : i32
    %c0_i32_1 = arith.constant 0 : i32
    return %c0_i32, %c0_i32_0 : i32, i32
  }
  func.func @transform_22(%arg0: i32, %arg1: i32) -> (i32, i32) {
    %c0_i32 = arith.constant 0 : i32
    %c0_i32_0 = arith.constant 0 : i32
    %c0_i32_1 = arith.constant 0 : i32
    return %c0_i32, %c0_i32_0 : i32, i32
  }
  func.func @transform_23(%arg0: i32, %arg1: i32) -> (i32, i32, i32) {
    %c0_i32 = arith.constant 0 : i32
    %c0_i32_0 = arith.constant 0 : i32
    %c0_i32_1 = arith.constant 0 : i32
    return %arg0, %c0_i32, %c0_i32_0 : i32, i32, i32
  }
  func.func @transform_24(%arg0: i32, %arg1: i32) -> (i32, i32, i32) {
    %c0_i32 = arith.constant 0 : i32
    %c0_i32_0 = arith.constant 0 : i32
    %c0_i32_1 = arith.constant 0 : i32
    return %arg0, %c0_i32, %c0_i32_0 : i32, i32, i32
  }
}

</mosaic_0001>

<bundles_post_ra>
// kernel: forward.1
= control target key start
LH: loop header
LB: loop body
LE: loop exit
PB: predicated region body
PF: predicated region fallthrough
CT: control target
= control target key end

     0   :  { %s3019_s0 = inlined_call_operand.vmem [shape: bf16[2,9,16], index: 0, kind: input, shape index: {}]   ;;  %s3020_s1 = inlined_call_operand.vmem [shape: f32[2,9,32], index: 1, kind: input, shape index: {}]   ;;  %s3021_s2 = inlined_call_operand.vmem [shape: bf16[16,32], index: 2, kind: input, shape index: {}]   ;;  %s3022_s3 = inlined_call_operand.vmem [shape: f32[9,32], index: 3, kind: input, shape index: {}]   ;;  %s3023_s4 = inlined_call_operand.vmem [shape: f32[2,1,32], index: 4, kind: input, shape index: {}]   ;;  %s3024_s5 = inlined_call_operand.vmem [shape: f32[2,1,32], index: 5, kind: input, shape index: {}]   ;;  %s3025_s6 = inlined_call_operand.vmem [shape: bf16[2,32,16], index: 6, kind: input, shape index: {}]   ;;  %s3026_s7 = inlined_call_operand.vmem [shape: f32[2,1,16], index: 7, kind: input, shape index: {}]   ;;  %s3027_s8 = inlined_call_operand.vmem [shape: bf16[2,32,32], index: 8, kind: input, shape index: {}]   ;;  %s3028_s9 = inlined_call_operand.vmem [shape: bf16[2,32,32], index: 9, kind: input, shape index: {}]   ;;  %s3029_s10 = inlined_call_operand.vmem [shape: bf16[2,32,32], index: 10, kind: input, shape index: {}]   ;;  %s3030_s11 = inlined_call_operand.vmem [shape: bf16[2,32,32], index: 11, kind: input, shape index: {}]   ;;  %s3031_s12 = inlined_call_operand.vmem [shape: f32[2,1,32], index: 12, kind: input, shape index: {}]   ;;  %s3032_s13 = inlined_call_operand.vmem [shape: f32[2,1,32], index: 13, kind: input, shape index: {}]   ;;  %s3033_s14 = inlined_call_operand.vmem [shape: f32[2,1,32], index: 14, kind: input, shape index: {}]   ;;  %s3034_s15 = inlined_call_operand.vmem [shape: bf16[2,32,64], index: 15, kind: input, shape index: {}]   ;;  %s3035_s16 = inlined_call_operand.vmem [shape: f32[2,1,64], index: 16, kind: input, shape index: {}]   ;;  %s3036_s17 = inlined_call_operand.vmem [shape: bf16[2,64,32], index: 17, kind: input, shape index: {}]   ;;  %s3037_s18 = inlined_call_operand.vmem [shape: f32[2,1,32], index: 18, kind: input, shape index: {}]   ;;  %s3038_s19 = inlined_call_operand.vmem [shape: f32[1,32], index: 19, kind: input, shape index: {}]   ;;  %s3039_s20 = inlined_call_operand.vmem [shape: f32[1,32], index: 20, kind: input, shape index: {}]   ;;  %s3040_s21 = inlined_call_operand.vmem [shape: bf16[32,5], index: 21, kind: input, shape index: {}]   ;;  %s3041_s22 = inlined_call_operand.vmem [shape: f32[1,5], index: 22, kind: input, shape index: {}]   ;;  %s3042_s23 = inlined_call_operand.vmem [shape: f32[2,9,32], index: 23, kind: output, shape index: {0}]   ;;  %s3043_s24 = inlined_call_operand.hbm [shape: f32[2,1,5], index: 24, kind: output, shape index: {1}]  }
   0x1   :  { %3060 = sst [smem:[#allocation19_spill]] %s3019_s0 }
   0x2   :  { %3061 = sst [smem:[#allocation20_spill]] %s3020_s1 }
   0x3   :  { %3062 = sst [smem:[#allocation21_spill]] %s3021_s2 }
   0x4   :  { %3063 = sst [smem:[#allocation22_spill]] %s3022_s3 }
   0x5   :  { %3064 = sst [smem:[#allocation23_spill]] %s3023_s4 }
   0x6   :  { %3065 = sst [smem:[#allocation24_spill]] %s3024_s5 }
   0x7   :  { %3066 = sst [smem:[#allocation25_spill]] %s3025_s6 }
   0x8   :  { %3067 = sst [smem:[#allocation26_spill]] %s3026_s7 }
   0x9   :  { %3068 = sst [smem:[#allocation27_spill]] %s3027_s8 }
   0xa   :  { %3069 = sst [smem:[#allocation28_spill]] %s3028_s9 }
   0xb   :  { %3070 = sst [smem:[#allocation29_spill]] %s3029_s10 }
   0xc   :  { %3071 = sst [smem:[#allocation30_spill]] %s3030_s11 }
   0xd   :  { %3072 = sst [smem:[#allocation31_spill]] %s3031_s12 }
   0xe   :  { %3073 = sst [smem:[#allocation32_spill]] %s3032_s13 }
   0xf   :  { %3074 = sst [smem:[#allocation33_spill]] %s3036_s17 }
  0x10   :  { %3075 = sst [smem:[#allocation34_spill]] %s3037_s18 }
  0x11   :  { %3076 = sst [smem:[#allocation35_spill]] %s3038_s19 }
  0x12   :  { %3077 = sst [smem:[#allocation36_spill]] %s3039_s20 }
  0x13   :  { %3078 = sst [smem:[#allocation37_spill]] %s3040_s21 }
  0x14   :  { %3079 = sst [smem:[#allocation38_spill]] %s3041_s22 }
  0x15   :  { %3080 = sst [smem:[#allocation39_spill]] %s3042_s23 }
  0x16   :  { %3081 = sst [smem:[#allocation40_spill]] %s3043_s24 }
  0x17   :  { %30 = vsyncpa [#allocation4], 0 }
  0x18   :  { %32 = vsyncpa [#allocation4 + $0x1], 0  ;;  %s2616_s5 = smov 0   ;;  %s2618_s26 = smov 0  }
  0x19   :  { %s2620_s27 = smov 0   ;;  %s2622_s28 = smov 0  }
  0x1a   :  { %s2624_s6 = smov 0   ;;  %s2626_s2 = smov 0  }
  0x1b   :  { %s2628_s29 = smov 0   ;;  %s2630_s0 = smov 0  }
  0x1c LB: > { %3082 = sst [smem:[#allocation6_spill]] %s2457_s5  ;;  %s2120_s7 = sadd.s32 4294967295, %s2485_s0   ;;  %s2485_s0 = sphi %s2630_s0, %s38_s0   ;;  %s2481_s29 = sphi %s2628_s29, %s3147_s29   ;;  %s2477_s2 = sphi %s2626_s2, %s3146_s2   ;;  %s2473_s6 = sphi %s2624_s6, %s3145_s6   ;;  %s2469_s28 = sphi %s2622_s28, %s3144_s28   ;;  %s2465_s27 = sphi %s2620_s27, %s3143_s27   ;;  %s2461_s26 = sphi %s2618_s26, %s3149_s26   ;;  %s2457_s5 = sphi %s2616_s5, %s3148_s5  }
  0x1d   : > { %3083 = sst [smem:[#allocation7_spill]] %s2465_s27  ;;  %s2121_s30 = sadd.s32 4294967294, %s2485_s0  }
  0x1e   : > { %3084 = sst [smem:[#allocation8_spill]] %s2469_s28  ;;  %s47_s3 = sadd.s32 1, %s2477_s2 }
  0x1f   : > { %3085 = sst [smem:[#allocation9_spill]] %s2473_s6  ;;  %p48_p0 = scmp.ge.s32.totalorder %s47_s3, 2 }
  0x20   : > { %3086 = sst [smem:[#allocation10_spill]] %s2477_s2  ;;  %s50_s25 = sadd.s32 1, %s2481_s29 }
  0x21   : > { %3087 = sst [smem:[#allocation11_spill]] %s2481_s29  ;;  %p661_p1 = scmp.ne.s32.totalorder %s2465_s27, %s2461_s26 }
  0x22   : > { %3088 = sst [smem:[#allocation12_spill]] %s2485_s0  ;;  %p662_p2 = scmp.eq.s32.totalorder %s2120_s7, 3 }
  0x23   : > { %s3151_s3 = smov (%p48_p0, %s47_s3), 0  ;;  %s3153_s25 = smov (!%p48_p0, %s50_s25), %s2481_s29 }
  0x24   : > { %3089 = sst [smem:[#allocation13_spill]] %s3151_s3  ;;  %p2665_p3 = por %p662_p2, %p661_p1 }
  0x25   : > { %p667_p4 = scmp.ne.s32.totalorder %s2461_s26, %s2457_s5  ;;  %p52_p5 = scmp.ge.s32.totalorder %s3153_s25, 2 }
  0x26   : > { %s3090_s8 = scalar_select %p2665_p3, 1, 0 }
  0x27   : > { %p668_p6 = scmp.eq.s32.totalorder %s2121_s30, 3  ;;  %p2124_p7 = scmp.ge.s32.totalorder %s2485_s0, 1 }
  0x28   : > { %3091 = sst [smem:[#allocation14_spill]] %s3090_s8  ;;  %p824_p8 = scmp.lt.s32.totalorder %s2485_s0, 5 }
  0x29   : > { %s3155_s25 = smov (%p52_p5, %s3153_s25), 0  ;;  %p2675_p9 = por %p668_p6, %p667_p4 }
  0x2a   : > { %3092 = sst [smem:[#allocation15_spill]] %s3155_s25  ;;  %p825_p10 = pnand %p2124_p7, %p824_p8 }
  0x2b   : > { %s3093_s4 = scalar_select %p2675_p9, 1, 0 }
  0x2c   : > { %s648_s1 = ssub.s32 %s2481_s29, %s3155_s25  ;;  %s651_s7 = sadd.s32 1, %s2465_s27 }
  0x2d   : > { %3094 = sst [smem:[#allocation16_spill]] %s3093_s4  ;;  %p649_p11 = scmp.eq.s32.totalorder %s648_s1, 0 }
  0x2e   : > { %828 = sbr.rel (%p825_p10) target bundleno = 2553 (0x9f9), region = 112 }
  0x2f   : > { %s2683_s3 = scalar_select %p649_p11, %s2465_s27, %s651_s7  }
  0x31   : > { %3095 = sst [smem:[#allocation17_spill]] %s2683_s3 }
  0x33   : > { %p958_p12 = scmp.lt.s32.totalorder %s2473_s6, 1  ;;  %p968_p13 = scmp.lt.s32.totalorder %s2469_s28, 1 }
  0x34   : > { %s3096_s3 = sld [smem:[#allocation19_spill]] }
  0x35   : > { %s959_s2 = scalar_select %p958_p12, %s2473_s6, 1 }
  0x36   : > { %s2690_s5 = scalar_select %p968_p13, %s2469_s28, 1 }
  0x37   : > { %s2246_s1 = sshll.u32 %s959_s2, 3  ;;  %s2247_s7 = sshll.u32 %s959_s2, 4 }
  0x38   : > { %s3097_s0 = sld [smem:[#allocation20_spill]]  ;;  %s2248_s23 = sshll.u32 %s2690_s5, 4 }
  0x39   : > { %s3102_s30 = sld [smem:[#allocation25_spill]] }
  0x3a   : > { %s962_s27 = scalar_lea.vmem %s3096_s3, %s2246_s1  ;;  %s3103_s24 = sld [smem:[#allocation27_spill]] }
  0x3b   : > { %s3104_s9 = sld [smem:[#allocation28_spill]] }
  0x3c   : > { %s3105_s10 = sld [smem:[#allocation29_spill]] }
  0x3d   : > { %s3106_s11 = sld [smem:[#allocation30_spill]] }
  0x3e   : > { %s2698_s8 = scalar_lea.vmem %s3097_s0, %s2247_s7  ;;  %s3109_s18 = sld [smem:[#allocation34_spill]] }
  0x3f   : > { %3098 = sst [smem:[#allocation18_spill]] %s2698_s8  ;;  %s2716_s0 = scalar_lea.vmem %s3102_s30, %s2248_s23 }
  0x40   : > { %s2721_s6 = scalar_lea.vmem %s3103_s24, %s2248_s23  ;;  %s3110_s20 = sld [smem:[#allocation33_spill]] }
  0x41   : > { %s2726_s19 = scalar_lea.vmem %s3104_s9, %s2248_s23  ;;  %s2753_s9 = scalar_lea.vmem %s3034_s15, %s2248_s23 }
  0x42   : > { %s2731_s17 = scalar_lea.vmem %s3105_s10, %s2248_s23  ;;  %s3111_s3 = sld [smem:[#allocation39_spill]] }
  0x43   : > { %s2736_s1 = scalar_lea.vmem %s3106_s11, %s2248_s23  ;;  %s2254_s11 = sshll.u32 %s2690_s5, 5 }
  0x44   : > { %s1026_s12 = scalar_lea.vmem %s3109_s18, %s2690_s5  ;;  %s3112_s23 = sand.u32 1, %s2461_s26  }
  0x45   : > { %s2776_s28 = scalar_lea.vmem [#allocation3], %s3112_s23  ;;  %s3113_s29 = sld [smem:[#allocation8_spill]] }
  0x46   : > { %s2767_s13 = scalar_lea.vmem %s3110_s20, %s2254_s11 }
  0x48   : > { %s2772_s21 = scalar_lea.vmem %s3111_s3, %s2247_s7 }
  0x4b   : > { %p2145_p0 = scmp.ne.s32.totalorder %s3113_s29, 0 }
  0x4c   : > { %s3114_s4 = sld [smem:[#allocation21_spill]] (!%p2145_p0) }
  0x4d   : > { %1036 = sbr.rel (%p2145_p0) target bundleno = 223 (0xdf), region = 116  ;;  %s3115_s7 = sld [smem:[#allocation22_spill]] (!%p2145_p0) }
  0x52   : > { %v2257_v0 = vld [vmem:[%s3114_s4] sm:$0xff]  ;;  %vm1054_vm0 = vcmask 130048   ;;  %vm1072_vm1 = vcmask 261120   ;;  %vm1074_vm2 = vcmask 253952  }
  0x53   : > { %v2148_v1 = vld [vmem:[%s962_s27] sm:$0xf]  ;;  %v2256_v2 = vld [vmem:[%s962_s27] sm:$0x10]  ;;  %1065 = vmatpush.bf16.msra.mxu0 %v2257_v0  ;;  %v1042_v7 = vld [vmem:[%s3115_s7 + $0x8] sm:$0x1] }
  0x54   : > { %v2149_v3 = vor.u32 %v2256_v2, %v2148_v1  ;;  %v1041_v4 = vld [vmem:[%s3115_s7] sm:$0xff] }
  0x56   : > { %2154 = vmatmul.msk.bf16.vlgmr.msra.gmra.mxu0 %vm1054_vm0, %v2149_v3 }
  0xd3   : > { %v1067_v5 = vpop.f32.mrf.mxu0 }
  0xd4   : > { %v1068_v6 = vadd.f32 %v1067_v5, %v1041_v4 }
  0xd6   : > { %1073 = vst.msk [vmem:[#allocation2] sm:$0xff] %vm1072_vm1, %v1068_v6 }
  0xdb   : > { %v1069_v8 = vpop.f32.mrf.mxu0 }
  0xdc   : > { %v1070_v9 = vadd.f32 %v1069_v8, %v1042_v7 }
  0xde   : > { %1075 = vst.msk [vmem:[#allocation2 + $0x8] sm:$0x1] %vm1074_vm2, %v1070_v9 }
  0xdf PF: > { %v2788_v10 = vld [vmem:[#allocation2] sm:$0xff]  ;;  %s3116_s10 = sld [smem:[#allocation18_spill]]  ;;  %vm1082_vm3 = vcmask 261120   ;;  %vm1086_vm4 = vcmask 253952   ;;  %v2487_v14 = vmov 32.0   ;;  %v2259_v17 = vld [vmem:[%s2716_s0 + $0x8] sm:$0xff] }
  0xe0   : > { %v1083_v11 = vsel %vm1082_vm3, %v2788_v10, 0.0  ;;  %2359 = vrcp.f32 %v2487_v14  ;;  %1193 = vmatpush.bf16.msra.mxu1 %v2259_v17  ;;  %v2258_v19 = vld [vmem:[%s2716_s0] sm:$0xff]  ;;  %1176 = vmatpush.bf16.msra.mxu0 %v2259_v17  ;;  %v2261_v36 = vld [vmem:[%s2721_s6 + $0x8] sm:$0xff]  ;;  %s3119_s8 = sld [smem:[#allocation23_spill]]  ;;  %s2488_s2 = smov 16   ;;  %vm1306_vm12 = vcmask 130048  }
  0xe1   : > { %1084 = vadd.xlane.f32.xlu0 %v1083_v11  ;;  %v2263_v37 = vld [vmem:[%s2726_s19 + $0x8] sm:$0xff]  ;;  %1223 = vmatpush.bf16.msra.mxu2 %v2261_v36  ;;  %v2260_v39 = vld [vmem:[%s2721_s6] sm:$0xff]  ;;  %s3117_s6 = sld [smem:[#allocation26_spill]]  ;;  %s2489_s4 = smov 112   ;;  %vm1355_vm13 = vcmask 1043456   ;;  %vm1356_vm14 = vcmask 1044480  }
  0xe2   : > { %1253 = vmatpush.bf16.msra.mxu3 %v2263_v37  ;;  %v2262_v40 = vld [vmem:[%s2726_s19] sm:$0xff]  ;;  %v2265_v44 = vld [vmem:[%s2731_s17 + $0x8] sm:$0xff]  ;;  %s3121_s29 = sld [smem:[#allocation24_spill]]  ;;  %vm1331_vm15 = vcmask 65536   ;;  %vm1327_vm0 = vcmask 72704  }
  0xe3   : > { %v2264_v46 = vld [vmem:[%s2731_s17] sm:$0xff]  ;;  %s3123_s18 = sld [smem:[#allocation31_spill]] }
  0xe4   : > { %1194 = vmatpush.bf16.msra.mxu1 %v2258_v19  ;;  %1177 = vmatpush.bf16.msra.mxu0 %v2258_v19  ;;  %s3130_s22 = sld [smem:[#allocation8_spill]] }
  0xe5   : > { %v2792_v12 = vld [vmem:[#allocation2 + $0x8] sm:$0x1]  ;;  %v2799_v20 = vld [vmem:[%s3116_s10] sm:$0xff]  ;;  %1224 = vmatpush.bf16.msra.mxu2 %v2260_v39  ;;  %v2490_v39 = vmov 65535  }
  0xe6   : > { %v1087_v13 = vsel %vm1086_vm4, %v2792_v12, 0.0  ;;  %v2360_v15 = vpop.eup %2359  ;;  %v2802_v21 = vld [vmem:[%s3116_s10 + $0x8] sm:$0x1]  ;;  %1254 = vmatpush.bf16.msra.mxu3 %v2262_v40  ;;  %s3120_s24 = scalar_lea.vmem %s3119_s8, %s2690_s5  ;;  %v1357_v40 = vsel %vm1355_vm13, 4294967295, %v2490_v39  ;;  %s3125_s10 = sld [smem:[#allocation32_spill]] }
  0xe7   : > { %v1091_v16 = vmul.f32 32.0, %v2360_v15  ;;  %v1146_v22 = vpack.c.bf16 %v2802_v21, %v2799_v20  ;;  %vm1095_vm5 = vweird.f32 %v2360_v15  ;;  %s3118_s19 = scalar_lea.vmem %s3117_s6, %s2690_s5  ;;  %v2351_v0 = vld [vmem:[%s3120_s24] ss:$0 sm:$0xff]  ;;  %s3128_s8 = scalar_lea.vmem %s3035_s16, %s2690_s5 }
  0xe8   : > { %1283 = vmatpush.bf16.msrb.mxu0 %v2265_v44  ;;  %v2353_v57 = vld [vmem:[%s3118_s19] ss:$0 sm:$0xff]  ;;  %s3122_s25 = scalar_lea.vmem %s3121_s29, %s2690_s5  ;;  %s3127_s19 = scalar_lea.vmem %s3033_s14, %s2690_s5 }
  0xe9   : > { %1088 = vadd.xlane.f32.xlu0 %v1087_v13  ;;  %v1092_v18 = vsub.f32 1.0, %v1091_v16  ;;  %2164 = vmatmul.msk.bf16.vlgmr.msra.gmra.mxu1 %vm1082_vm3, %v1146_v22  ;;  %v2352_v5 = vld [vmem:[%s3122_s25] ss:$0 sm:$0xff]  ;;  %s3124_s3 = scalar_lea.vmem %s3123_s18, %s2690_s5 }
  0xea   : > { %p2234_p1 = scmp.ne.s32.totalorder %s3130_s22, 1 }
  0xeb   : > { %v1093_v23 = vmul.f32 %v2360_v15, %v1092_v18  ;;  %s3131_s23 = sld [smem:[#allocation37_spill]] (!%p2234_p1) }
  0xec   : > { %1284 = vmatpush.bf16.msrb.mxu0 %v2264_v46  ;;  %v2849_v46 = vsel %vm1356_vm14, %v1357_v40, 0  ;;  %v2267_v40 = vld [vmem:[%s2736_s1 + $0x8] sm:$0xff]  ;;  %s3126_s27 = scalar_lea.vmem %s3125_s10, %s2690_s5  ;;  %s3134_s10 = sld [smem:[#allocation38_spill]] (!%p2234_p1) }
  0xed   : > { %v1094_v24 = vadd.f32 %v2360_v15, %v1093_v23 }
  0xef   : > { %v2807_v25 = vsel %vm1095_vm5, %v2360_v15, %v1094_v24 }
 0x154   : > { %v1085_v26 = vpop.xlane.xlu0 %1084 }
 0x155   : > { %v1097_v27 = vmul.f32 %v2807_v25, %v1085_v26 }
 0x157   : > { %v1099_v28 = vsub.f32 %v2788_v10, %v1097_v27 }
 0x159   : > { %v1101_v29 = vmul.f32 %v1099_v28, %v1099_v28 }
 0x15b   : > { %v1103_v30 = vsel %vm1082_vm3, %v1101_v29, 0.0 }
 0x15c   : > { %1104 = vadd.xlane.f32.xlu1 %v1103_v30  ;;  %v1089_v31 = vpop.xlane.xlu0 %1088 }
 0x15d   : > { %v1098_v32 = vmul.f32 %v2807_v25, %v1089_v31 }
 0x15f   : > { %v1100_v33 = vsub.f32 %v2792_v12, %v1098_v32 }
 0x161   : > { %v1102_v34 = vmul.f32 %v1100_v33, %v1100_v33 }
 0x163   : > { %v1106_v35 = vsel %vm1086_vm4, %v1102_v34, 0.0 }
 0x164   : > { %1107 = vadd.xlane.f32.xlu1 %v1106_v35 }
 0x166   : > { %v1196_v58 = vpop.f32.mrf.mxu1 }
 0x167   : > { %v1197_v61 = vadd.f32 %v2353_v57, %v1196_v58 }
 0x169   : > { %1390 = vrot.lane.b32.xlu2 %v1197_v61, %s2488_s2 }
 0x16e   : > { %v1198_v6 = vpop.f32.mrf.mxu1 }
 0x16f   : > { %v1199_v7 = vadd.f32 %v2353_v57, %v1198_v6 }
 0x171   : > { %1392 = vrot.lane.b32.xlu2 %v1199_v7, %s2488_s2 }
 0x1c3   : > { %v1391_v17 = vpop.permute.xlu2 %1390 }
 0x1cb   : > { %v2842_v26 = vpop.permute.xlu2 %1392 }
 0x1cf   : > { %v1105_v38 = vpop.xlane.xlu1 %1104 }
 0x1d0   : > { %v1109_v41 = vmul.f32 %v1105_v38, %v2807_v25 }
 0x1d2   : > { %v1111_v42 = vadd.f32 1e-05, %v1109_v41 }
 0x1d4   : > { %2361 = vrsqrt.f32 %v1111_v42  ;;  %vm1119_vm7 = vweird.f32 %v1111_v42 }
 0x1d7   : > { %v1108_v43 = vpop.xlane.xlu1 %1107 }
 0x1d8   : > { %v1110_v45 = vmul.f32 %v1108_v43, %v2807_v25 }
 0x1da   : > { %v2362_v47 = vpop.eup %2361  ;;  %v1112_v48 = vadd.f32 1e-05, %v1110_v45 }
 0x1db   : > { %v1114_v49 = vmul.f32 %v2362_v47, %v1111_v42  ;;  %vm1120_vm6 = vweird.f32 %v2362_v47 }
 0x1dc   : > { %2363 = vrsqrt.f32 %v1112_v48  ;;  %vm1121_vm8 = vmor %vm1119_vm7, %vm1120_vm6  ;;  %vm1129_vm10 = vweird.f32 %v1112_v48 }
 0x1dd   : > { %v1115_v50 = vmul.f32 %v2362_v47, %v1114_v49 }
 0x1df   : > { %v1116_v51 = vmul.f32 0.5, %v1115_v50 }
 0x1e1   : > { %v1117_v52 = vsub.f32 1.5, %v1116_v51 }
 0x1e2   : > { %v2364_v53 = vpop.eup %2363 }
 0x1e3   : > { %v1118_v54 = vmul.f32 %v2362_v47, %v1117_v52  ;;  %v1124_v55 = vmul.f32 %v2364_v53, %v1112_v48  ;;  %vm1130_vm9 = vweird.f32 %v2364_v53 }
 0x1e4   : > { %vm1131_vm11 = vmor %vm1129_vm10, %vm1130_vm9 }
 0x1e5   : > { %v1125_v56 = vmul.f32 %v2364_v53, %v1124_v55  ;;  %v1122_v59 = vsel %vm1121_vm8, %v2362_v47, %v1118_v54 }
 0x1e6   : > { %v1133_v63 = vmul.f32 %v1122_v59, %v1099_v28 }
 0x1e7   : > { %v1126_v60 = vmul.f32 0.5, %v1125_v56 }
 0x1e8   : > { %v1138_v4 = vmul.f32 %v2351_v0, %v1133_v63 }
 0x1e9   : > { %v1127_v62 = vsub.f32 1.5, %v1126_v60 }
 0x1ea   : > { %v1143_v9 = vadd.f32 %v2352_v5, %v1138_v4 }
 0x1eb   : > { %v1128_v1 = vmul.f32 %v2364_v53, %v1127_v62 }
 0x1ed   : > { %v1132_v2 = vsel %vm1131_vm11, %v2364_v53, %v1128_v1 }
 0x1ee   : > { %v1134_v3 = vmul.f32 %v1132_v2, %v1100_v33 }
 0x1f0   : > { %v1139_v8 = vmul.f32 %v2351_v0, %v1134_v3 }
 0x1f2   : > { %v1144_v11 = vadd.f32 %v2352_v5, %v1139_v8 }
 0x1f4   : > { %v1145_v13 = vpack.c.bf16 %v1144_v11, %v1143_v9 }
 0x1f6   : > { %2163 = vmatmul.msk.bf16.vlgmr.msra.gmra.mxu0 %vm1082_vm3, %v1145_v13  ;;  %2173 = vmatmul.msk.bf16.vlgmr.msra.gmra.mxu2 %vm1082_vm3, %v1145_v13 }
 0x1f7   : > { %2182 = vmatmul.msk.bf16.vlgmr.msra.gmra.mxu3 %vm1082_vm3, %v1145_v13 }
 0x206   : > { %2191 = vmatmul.msk.bf16.vlgmr.msrb.gmra.mxu0 %vm1082_vm3, %v1145_v13 }
 0x273   : > { %v1179_v14 = vpop.f32.mrf.mxu0 }
 0x274   : > { %v1180_v15 = vadd.f32 %v2353_v57, %v1179_v14 }
 0x276   : > { %v1291_v16 = vmul.f32 0.25, %v1180_v15 }
 0x278   : > { %1379 = vrot.lane.b32.xlu0 %v1291_v16, %s2488_s2 }
 0x279   : > { %v1226_v22 = vpop.f32.mrf.mxu2 }
 0x27a   : > { %v1256_v18 = vpop.f32.mrf.mxu3  ;;  %v1297_v41 = vmul.f32 %v1291_v16, %v1226_v22 }
 0x27b   : > { %v1181_v19 = vpop.f32.mrf.mxu0  ;;  %v1300_v28 = vmul.f32 %v1256_v18, %v1197_v61  ;;  %v1396_v29 = vmul.f32 %v1391_v17, %v1256_v18 }
 0x27c   : > { %v1182_v23 = vadd.f32 %v2353_v57, %v1181_v19 }
 0x27e   : > { %v1292_v24 = vmul.f32 0.25, %v1182_v23 }
 0x280   : > { %1381 = vrot.lane.b32.xlu1 %v1292_v24, %s2488_s2 }
 0x281   : > { %v1228_v36 = vpop.f32.mrf.mxu2 }
 0x282   : > { %v1258_v27 = vpop.f32.mrf.mxu3  ;;  %v1298_v38 = vmul.f32 %v1292_v24, %v1228_v36 }
 0x283   : > { %v1301_v30 = vmul.f32 %v1258_v27, %v1199_v7  ;;  %v1397_v31 = vmul.f32 %v2842_v26, %v1258_v27  ;;  %v1286_v32 = vpop.f32.mrf.mxu0 }
 0x284   : > { %v2845_v33 = vmul.f32 %v1391_v17, %v1286_v32  ;;  %v1303_v43 = vmul.f32 %v1286_v32, %v1197_v61  ;;  %v1299_v45 = vpack.c.bf16 %v1298_v38, %v1297_v41  ;;  %v2266_v38 = vld [vmem:[%s2736_s1] sm:$0xff]  ;;  %s3132_s1 = sld [smem:[#allocation35_spill]] (!%p2234_p1) }
 0x285   : > { %v1398_v34 = vpack.c.bf16 %v1397_v31, %v1396_v29  ;;  %v1302_v35 = vpack.c.bf16 %v1301_v30, %v1300_v28 }
 0x287   : > { %1406 = vrot.lane.b32.xlu2 %v1398_v34, %s2489_s4  ;;  %v1311_v37 = vsel %vm1306_vm12, %v1302_v35, 0 }
 0x288   : > { %1320 = vmatpush.bf16.xpose.msrb.mxu1 %v1311_v37 }
 0x28b   : > { %v1288_v42 = vpop.f32.mrf.mxu0 }
 0x28c   : > { %v1304_v44 = vmul.f32 %v1288_v42, %v1199_v7  ;;  %v1400_v13 = vmul.f32 %v2842_v26, %v1288_v42 }
 0x28e   : > { %v1305_v47 = vpack.c.bf16 %v1304_v44, %v1303_v43  ;;  %v1401_v14 = vpack.c.bf16 %v1400_v13, %v2845_v33 }
 0x28f   : > { %2192 = vmatmul.msk.bf16.vlgmr.msrb.gmra.mxu1 %vm1306_vm12, %v1299_v45 }
 0x290   : > { %v1360_v48 = vand.u32 %v2849_v46, %v1305_v47  ;;  %1491 = vmatpush.bf16.msra.mxu1 %v2267_v40 }
 0x292   : > { %1369 = vmatpush.bf16.msrb.mxu2 %v1360_v48 }
 0x296   : > { %1514 = vmatpush.bf16.msra.mxu2 %v2266_v38  ;;  %v2356_v38 = vld [vmem:[%s3127_s19] ss:$0 sm:$0xff] }
 0x2e1   : > { %v1407_v49 = vpop.permute.xlu2 %1406 }
 0x2e2   : > { %v1412_v50 = vsel %vm1306_vm12, %v1407_v49, 0 }
 0x2e3   : > { %1421 = vmatpush.bf16.xpose.msrb.mxu3 %v1412_v50 }
 0x2ea   : > { %v1380_v51 = vpop.permute.xlu0 %1379 }
 0x2eb   : > { %v1385_v53 = vmul.f32 %v1380_v51, %v1226_v22 }
 0x2f2   : > { %v1382_v52 = vpop.permute.xlu1 %1381 }
 0x2f3   : > { %v1386_v54 = vmul.f32 %v1382_v52, %v1228_v36 }
 0x2f5   : > { %v1387_v55 = vpack.c.bf16 %v1386_v54, %v1385_v53  ;;  %v2354_v53 = vld [vmem:[%s3124_s3] ss:$0 sm:$0xff]  ;;  %s3133_s3 = sld [smem:[#allocation36_spill]] (!%p2234_p1) }
 0x2f7   : > { %1403 = vrot.lane.b32.xlu2 %v1387_v55, %s2489_s4 }
 0x30c   : > { %v1322_v56 = vpop.f32.mrf.mxu1 }
 0x30d   : > { %v1328_v59 = vsel %vm1327_vm0, %v1322_v56, -inf }
 0x314   : > { %v1324_v57 = vpop.f32.mrf.mxu1 }
 0x315   : > { %v1332_v58 = vsel %vm1331_vm15, %v1324_v57, -inf }
 0x316   : > { %1333 = vmax.xlane.f32.xlu0 %v1332_v58 }
 0x320   : > { %1329 = vmax.xlane.f32.xlu2 %v1328_v59 }
 0x351   : > { %v1404_v60 = vpop.permute.xlu2 %1403 }
 0x352   : > { %2194 = vmatmul.msk.bf16.vlgmr.msrb.gmra.mxu3 %vm1306_vm12, %v1404_v60 }
 0x389   : > { %v1334_v2 = vpop.xlane.xlu0 %1333 }
 0x38a   : > { %v1336_v3 = vsub.f32 %v1324_v57, %v1334_v2 }
 0x38c   : > { %v1339_v6 = vmul.f32 1.442695, %v1336_v3 }
 0x393   : > { %v1330_v61 = vpop.xlane.xlu2 %1329 }
 0x394   : > { %v1335_v62 = vsub.f32 %v1322_v56, %v1330_v61 }
 0x396   : > { %v1337_v63 = vmul.f32 1.442695, %v1335_v62 }
 0x398   : > { %2365 = vpow2.f32 %v1337_v63 }
 0x399   : > { %2367 = vpow2.f32 %v1339_v6 }
 0x39e   : > { %v2366_v0 = vpop.eup %2365 }
 0x39f   : > { %v1341_v1 = vsel %vm1327_vm0, %v2366_v0, 0.0  ;;  %v2368_v9 = vpop.eup %2367 }
 0x3a0   : > { %1342 = vadd.xlane.f32.xlu0 %v1341_v1  ;;  %v1344_v11 = vsel %vm1331_vm15, %v2368_v9, 0.0 }
 0x3d5   : > { %v1423_v4 = vpop.f32.mrf.mxu3 }
 0x3d6   : > { %v1428_v5 = vsel %vm1327_vm0, %v1423_v4, -inf }
 0x3d7   : > { %1429 = vmax.xlane.f32.xlu1 %v1428_v5 }
 0x3dd   : > { %v1425_v7 = vpop.f32.mrf.mxu3 }
 0x3de   : > { %v1431_v8 = vsel %vm1331_vm15, %v1425_v7, -inf }
 0x3df   : > { %1432 = vmax.xlane.f32.xlu2 %v1431_v8 }
 0x3e7   : > { %1345 = vadd.xlane.f32.xlu2 %v1344_v11 }
 0x3ff   : > { %1452 = vrot.lane.b32.xlu2 %v1401_v14, %s2489_s4 }
 0x413   : > { %v1343_v24 = vpop.xlane.xlu0 %1342 }
 0x44a   : > { %v1430_v15 = vpop.xlane.xlu1 %1429 }
 0x44b   : > { %v1434_v16 = vsub.f32 %v1423_v4, %v1430_v15  ;;  %v2268_v15 = vld [vmem:[%s2753_s9] sm:$0xff] }
 0x44d   : > { %v1436_v17 = vmul.f32 1.442695, %v1434_v16 }
 0x44f   : > { %2369 = vpow2.f32 %v1436_v17 }
 0x452   : > { %v1433_v18 = vpop.xlane.xlu2 %1432 }
 0x453   : > { %v1435_v19 = vsub.f32 %v1425_v7, %v1433_v18 }
 0x455   : > { %v2370_v22 = vpop.eup %2369  ;;  %v1438_v23 = vmul.f32 1.442695, %v1435_v19 }
 0x456   : > { %v1440_v27 = vsel %vm1327_vm0, %v2370_v22, 0.0 }
 0x457   : > { %2371 = vpow2.f32 %v1438_v23  ;;  %1441 = vadd.xlane.f32.xlu1 %v1440_v27 }
 0x458   : > { %2373 = vrcp.f32 %v1343_v24 }
 0x45a   : > { %v1346_v26 = vpop.xlane.xlu2 %1345 }
 0x45b   : > { %2375 = vrcp.f32 %v1346_v26 }
 0x45d   : > { %v2372_v28 = vpop.eup %2371 }
 0x45e   : > { %v1443_v29 = vsel %vm1331_vm15, %v2372_v28, 0.0  ;;  %v2374_v30 = vpop.eup %2373 }
 0x45f   : > { %1444 = vadd.xlane.f32.xlu0 %v1443_v29  ;;  %v1349_v32 = vmul.f32 %v2374_v30, %v2366_v0 }
 0x461   : > { %v2376_v31 = vpop.eup %2375 }
 0x462   : > { %v1350_v33 = vmul.f32 %v2376_v31, %v2368_v9  ;;  %v1453_v34 = vpop.permute.xlu2 %1452  ;;  %v2269_v9 = vld [vmem:[%s2753_s9 + $0x8] sm:$0xff] }
 0x463   : > { %v1458_v35 = vand.u32 %v1453_v34, %v2849_v46  ;;  %1617 = vmatpush.bf16.msra.mxu3 %v2269_v9  ;;  %v2355_v34 = vld [vmem:[%s3126_s27] ss:$0 sm:$0xff] }
 0x464   : > { %v1351_v36 = vpack.c.bf16 %v1350_v33, %v1349_v32 }
 0x465   : > { %1467 = vmatpush.bf16.msra.mxu0 %v1458_v35 }
 0x466   : > { %2193 = vmatmul.msk.bf16.vlgmr.msrb.gmra.mxu2 %vm1327_vm0, %v1351_v36 }
 0x467   : > { %1618 = vmatpush.bf16.msra.mxu3 %v2268_v15 }
 0x4ca   : > { %v1442_v37 = vpop.xlane.xlu1 %1441 }
 0x4cb   : > { %2377 = vrcp.f32 %v1442_v37 }
 0x4d1   : > { %v2378_v41 = vpop.eup %2377 }
 0x4d2   : > { %v1445_v39 = vpop.xlane.xlu0 %1444  ;;  %v1448_v43 = vmul.f32 %v2378_v41, %v2370_v22 }
 0x4d3   : > { %2379 = vrcp.f32 %v1445_v39 }
 0x4d9   : > { %v2380_v42 = vpop.eup %2379 }
 0x4da   : > { %v1449_v44 = vmul.f32 %v2380_v42, %v2372_v28 }
 0x4dc   : > { %v1450_v45 = vpack.c.bf16 %v1449_v44, %v1448_v43 }
 0x4de   : > { %2195 = vmatmul.msk.bf16.vlgmr.msra.gmra.mxu0 %vm1327_vm0, %v1450_v45  ;;  %v2357_v45 = vld [vmem:[%s3128_s8] ss:$0 sm:$0xff] }
 0x4e9   : > { %v1371_v46 = vpop.f32.mrf.mxu2 }
 0x4f1   : > { %v1373_v47 = vpop.f32.mrf.mxu2 }
 0x4f2   : > { %v1376_v48 = vpack.c.bf16 %v1373_v47, %v1371_v46 }
 0x4f4   : > { %2205 = vmatmul.msk.bf16.vlgmr.msra.gmra.mxu2 %vm1306_vm12, %v1376_v48 }
 0x55b   : > { %v1469_v49 = vpop.f32.mrf.mxu0 }
 0x563   : > { %v1471_v50 = vpop.f32.mrf.mxu0 }
 0x564   : > { %v1474_v51 = vpack.c.bf16 %v1471_v50, %v1469_v49 }
 0x566   : > { %2200 = vmatmul.msk.bf16.vlgmr.msra.gmra.mxu1 %vm1306_vm12, %v1474_v51 }
 0x577   : > { %v1516_v52 = vpop.f32.mrf.mxu2 }
 0x57f   : > { %v1518_v59 = vpop.f32.mrf.mxu2 }
 0x5e3   : > { %v1493_v54 = vpop.f32.mrf.mxu1 }
 0x5e4   : > { %v1517_v55 = vadd.f32 %v1516_v52, %v1493_v54 }
 0x5e6   : > { %v1525_v56 = vadd.f32 %v2354_v53, %v1517_v55 }
 0x5e8   : > { %v1527_v57 = vadd.f32 %v1525_v56, %v2788_v10 }
 0x5ea   : > { %v2881_v58 = vadd.f32 %v1527_v57, %v2799_v20 }
 0x5eb   : > { %v1495_v60 = vpop.f32.mrf.mxu1 }
 0x5ec   : > { %v1519_v61 = vadd.f32 %v1518_v59, %v1495_v60  ;;  %v1533_v62 = vsel %vm1082_vm3, %v2881_v58, 0.0 }
 0x5ed   : > { %1534 = vadd.xlane.f32.xlu1 %v1533_v62 }
 0x5ee   : > { %v1526_v63 = vadd.f32 %v2354_v53, %v1519_v61 }
 0x5f0   : > { %v1528_v0 = vadd.f32 %v1526_v63, %v2792_v12 }
 0x5f2   : > { %v2887_v1 = vadd.f32 %v1528_v0, %v2802_v21 }
 0x5f4   : > { %v1536_v10 = vsel %vm1086_vm4, %v2887_v1, 0.0 }
 0x5f5   : > { %1537 = vadd.xlane.f32.xlu0 %v1536_v10  ;;  %v2273_v10 = vld [vmem:[%s2767_s13 + $0x18] sm:$0xff] }
 0x5f6   : > { %1758 = vmatpush.bf16.msrb.mxu0 %v2273_v10 }
 0x660   : > { %v1535_v20 = vpop.xlane.xlu1 %1534 }
 0x661   : > { %v1539_v2 = vmul.f32 %v1535_v20, %v2807_v25 }
 0x663   : > { %v1541_v3 = vsub.f32 %v2881_v58, %v1539_v2 }
 0x665   : > { %v1543_v4 = vmul.f32 %v1541_v3, %v1541_v3 }
 0x667   : > { %v1545_v5 = vsel %vm1082_vm3, %v1543_v4, 0.0 }
 0x668   : > { %1546 = vadd.xlane.f32.xlu1 %v1545_v5  ;;  %v1538_v6 = vpop.xlane.xlu0 %1537 }
 0x669   : > { %v1540_v12 = vmul.f32 %v1538_v6, %v2807_v25 }
 0x66b   : > { %v1542_v21 = vsub.f32 %v2887_v1, %v1540_v12 }
 0x66d   : > { %v1544_v7 = vmul.f32 %v1542_v21, %v1542_v21 }
 0x66f   : > { %v1548_v8 = vsel %vm1086_vm4, %v1544_v7, 0.0 }
 0x670   : > { %1549 = vadd.xlane.f32.xlu0 %v1548_v8 }
 0x6db   : > { %v1547_v11 = vpop.xlane.xlu1 %1546 }
 0x6dc   : > { %v1551_v13 = vmul.f32 %v1547_v11, %v2807_v25 }
 0x6de   : > { %v1553_v14 = vadd.f32 1e-05, %v1551_v13 }
 0x6e0   : > { %2381 = vrsqrt.f32 %v1553_v14  ;;  %vm1561_vm2 = vweird.f32 %v1553_v14 }
 0x6e3   : > { %v1550_v16 = vpop.xlane.xlu0 %1549 }
 0x6e4   : > { %v1552_v17 = vmul.f32 %v1550_v16, %v2807_v25  ;;  %v2271_v16 = vld [vmem:[%s2767_s13 + $0x8] sm:$0xff] }
 0x6e6   : > { %v2382_v18 = vpop.eup %2381  ;;  %v1554_v19 = vadd.f32 1e-05, %v1552_v17 }
 0x6e7   : > { %v1556_v22 = vmul.f32 %v2382_v18, %v1553_v14  ;;  %vm1562_vm1 = vweird.f32 %v2382_v18 }
 0x6e8   : > { %2383 = vrsqrt.f32 %v1554_v19  ;;  %vm1563_vm5 = vmor %vm1561_vm2, %vm1562_vm1  ;;  %vm1571_vm7 = vweird.f32 %v1554_v19  ;;  %vm1750_vm1 = vcmask 523264  }
 0x6e9   : > { %v1557_v23 = vmul.f32 %v2382_v18, %v1556_v22 }
 0x6eb   : > { %v1558_v24 = vmul.f32 0.5, %v1557_v23 }
 0x6ed   : > { %v1559_v27 = vsub.f32 1.5, %v1558_v24  ;;  %v2270_v24 = vld [vmem:[%s2767_s13] sm:$0xff] }
 0x6ee   : > { %v2384_v26 = vpop.eup %2383 }
 0x6ef   : > { %v1560_v28 = vmul.f32 %v2382_v18, %v1559_v27  ;;  %v1566_v29 = vmul.f32 %v2384_v26, %v1554_v19  ;;  %vm1572_vm6 = vweird.f32 %v2384_v26 }
 0x6f0   : > { %vm1573_vm8 = vmor %vm1571_vm7, %vm1572_vm6 }
 0x6f1   : > { %v1567_v30 = vmul.f32 %v2384_v26, %v1566_v29  ;;  %v1564_v31 = vsel %vm1563_vm5, %v2382_v18, %v1560_v28 }
 0x6f2   : > { %v1575_v35 = vmul.f32 %v1564_v31, %v1541_v3 }
 0x6f3   : > { %v1568_v32 = vmul.f32 0.5, %v1567_v30 }
 0x6f4   : > { %v1580_v39 = vmul.f32 %v2355_v34, %v1575_v35 }
 0x6f5   : > { %v1569_v33 = vsub.f32 1.5, %v1568_v32 }
 0x6f6   : > { %v1585_v42 = vadd.f32 %v2356_v38, %v1580_v39 }
 0x6f7   : > { %v1570_v36 = vmul.f32 %v2384_v26, %v1569_v33 }
 0x6f9   : > { %v1574_v37 = vsel %vm1573_vm8, %v2384_v26, %v1570_v36 }
 0x6fa   : > { %v1576_v40 = vmul.f32 %v1574_v37, %v1542_v21  ;;  %v2272_v21 = vld [vmem:[%s2767_s13 + $0x10] sm:$0xff] }
 0x6fb   : > { %1759 = vmatpush.bf16.msrb.mxu0 %v2272_v21 }
 0x6fc   : > { %v1581_v41 = vmul.f32 %v2355_v34, %v1576_v40 }
 0x6fe   : > { %v1586_v43 = vadd.f32 %v2356_v38, %v1581_v41 }
 0x6ff   : > { %1760 = vmatpush.bf16.msrb.mxu0 %v2271_v16 }
 0x700   : > { %v1587_v44 = vpack.c.bf16 %v1586_v43, %v1585_v42 }
 0x702   : > { %2214 = vmatmul.msk.bf16.vlgmr.msra.gmra.mxu3 %vm1082_vm3, %v1587_v44 }
 0x703   : > { %1761 = vmatpush.bf16.msrb.mxu0 %v2270_v24 }
 0x785   : > { %v1620_v46 = vpop.f32.mrf.mxu3 }
 0x786   : > { %v2917_v47 = vadd.f32 %v2357_v45, %v1620_v46 }
 0x788   : > { %v2920_v48 = vmul.f32 0.70710677, %v2917_v47 }
 0x78a   : > { %v1629_v49 = vmul.f32 %v2920_v48, %v2920_v48 }
 0x78c   : > { %v1630_v50 = vmin.f32 %v1629_v49, 16.0 }
 0x78d   : > { %v1622_v51 = vpop.f32.mrf.mxu3 }
 0x78e   : > { %v1631_v52 = vmul.f32 2.1237322e-06, %v1630_v50  ;;  %v1642_v53 = vmul.f32 3.8918573e-05, %v1630_v50  ;;  %v2924_v54 = vadd.f32 %v2357_v45, %v1622_v51 }
 0x790   : > { %v1632_v55 = vadd.f32 0.00028619796, %v1631_v52  ;;  %v1643_v56 = vadd.f32 0.001143296, %v1642_v53  ;;  %v2927_v57 = vmul.f32 0.70710677, %v2924_v54 }
 0x792   : > { %v1644_v59 = vmul.f32 %v1643_v56, %v1630_v50  ;;  %v1669_v60 = vmul.f32 %v2927_v57, %v2927_v57  ;;  %v1633_v61 = vmul.f32 %v1632_v55, %v1630_v50 }
 0x794   : > { %v1645_v62 = vadd.f32 0.014752088, %v1644_v59  ;;  %v1670_v63 = vmin.f32 %v1669_v60, 16.0  ;;  %v1634_v3 = vadd.f32 0.0036580483, %v1633_v61 }
 0x796   : > { %v1646_v0 = vmul.f32 %v1645_v62, %v1630_v50  ;;  %v1671_v20 = vmul.f32 2.1237322e-06, %v1670_v63  ;;  %v1682_v2 = vmul.f32 3.8918573e-05, %v1670_v63  ;;  %v1635_v9 = vmul.f32 %v1634_v3, %v1630_v50 }
 0x798   : > { %v1647_v4 = vadd.f32 0.112945676, %v1646_v0  ;;  %v1672_v5 = vadd.f32 0.00028619796, %v1671_v20  ;;  %v1683_v6 = vadd.f32 0.001143296, %v1682_v2 }
 0x799   : > { %v1636_v18 = vadd.f32 0.05243302, %v1635_v9 }
 0x79a   : > { %v1648_v12 = vmul.f32 %v1647_v4, %v1630_v50  ;;  %v1673_v7 = vmul.f32 %v1672_v5, %v1670_v63  ;;  %v1684_v8 = vmul.f32 %v1683_v6, %v1670_v63  ;;  %v1625_v5 = vmul.f32 0.5, %v2917_v47 }
 0x79b   : > { %v1637_v26 = vmul.f32 %v1636_v18, %v1630_v50  ;;  %v1626_v6 = vmul.f32 0.5, %v2924_v54 }
 0x79c   : > { %v1649_v11 = vadd.f32 0.4994258, %v1648_v12  ;;  %v1674_v13 = vadd.f32 0.0036580483, %v1673_v7  ;;  %v1685_v14 = vadd.f32 0.014752088, %v1684_v8 }
 0x79d   : > { %v1638_v32 = vadd.f32 0.18741608, %v1637_v26 }
 0x79e   : > { %v1650_v15 = vmul.f32 %v1649_v11, %v1630_v50  ;;  %v1686_v17 = vmul.f32 %v1685_v14, %v1670_v63  ;;  %v1675_v22 = vmul.f32 %v1674_v13, %v1670_v63 }
 0x79f   : > { %v1639_v37 = vmul.f32 %v1638_v32, %v1630_v50 }
 0x7a0   : > { %v1651_v19 = vadd.f32 1.0, %v1650_v15  ;;  %v1687_v23 = vadd.f32 0.112945676, %v1686_v17  ;;  %v1676_v28 = vadd.f32 0.05243302, %v1675_v22 }
 0x7a1   : > { %v1640_v43 = vadd.f32 1.1283791, %v1639_v37 }
 0x7a2   : > { %2385 = vrcp.f32 %v1651_v19  ;;  %v1688_v27 = vmul.f32 %v1687_v23, %v1670_v63  ;;  %v1677_v34 = vmul.f32 %v1676_v28, %v1670_v63  ;;  %v1663_v39 = vand.u32 2147483648, %v1651_v19 }
 0x7a3   : > { %v1661_v41 = vand.u32 2147483647, %v1651_v19  ;;  %vm1657_vm10 = vweird.f32 %v1651_v19  ;;  %v1641_v53 = vmul.f32 %v1640_v43, %v2920_v48 }
 0x7a4   : > { %v1689_v29 = vadd.f32 0.4994258, %v1688_v27  ;;  %v1678_v40 = vadd.f32 0.18741608, %v1677_v34  ;;  %v1664_v46 = vor.u32 1.1754944e-38, %v1663_v39 }
 0x7a5   : > { %vm1662_vm12 = vcmp.eq.f32.partialorder %v1661_v41, 8.507059e+37 }
 0x7a6   : > { %v1690_v30 = vmul.f32 %v1689_v29, %v1670_v63  ;;  %v1679_v49 = vmul.f32 %v1678_v40, %v1670_v63 }
 0x7a8   : > { %v2386_v31 = vpop.eup %2385  ;;  %v1691_v35 = vadd.f32 1.0, %v1690_v30  ;;  %v1680_v50 = vadd.f32 1.1283791, %v1679_v49 }
 0x7a9   : > { %v1653_v33 = vmul.f32 %v2386_v31, %v1651_v19  ;;  %vm1658_vm9 = vweird.f32 %v2386_v31 }
 0x7aa   : > { %2387 = vrcp.f32 %v1691_v35  ;;  %vm1659_vm11 = vmor %vm1657_vm10, %vm1658_vm9  ;;  %v1703_v56 = vand.u32 2147483648, %v1691_v35  ;;  %v1701_v61 = vand.u32 2147483647, %v1691_v35  ;;  %vm1697_vm14 = vweird.f32 %v1691_v35 }
 0x7ab   : > { %v1654_v36 = vsub.f32 1.0, %v1653_v33  ;;  %v1681_v63 = vmul.f32 %v1680_v50, %v2927_v57  ;;  %v2358_v57 = vld [vmem:[%s1026_s12] ss:$0 sm:$0xff] }
 0x7ac   : > { %v1704_v0 = vor.u32 1.1754944e-38, %v1703_v56  ;;  %vm1702_vm0 = vcmp.eq.f32.partialorder %v1701_v61, 8.507059e+37 }
 0x7ad   : > { %v1655_v38 = vmul.f32 %v2386_v31, %v1654_v36 }
 0x7af   : > { %v1656_v42 = vadd.f32 %v2386_v31, %v1655_v38 }
 0x7b0   : > { %v2388_v44 = vpop.eup %2387 }
 0x7b1   : > { %v1660_v45 = vsel %vm1659_vm11, %v2386_v31, %v1656_v42  ;;  %v1693_v51 = vmul.f32 %v2388_v44, %v1691_v35  ;;  %vm1698_vm13 = vweird.f32 %v2388_v44 }
 0x7b2   : > { %v1665_v52 = vsel %vm1662_vm12, %v1664_v46, %v1660_v45  ;;  %vm1699_vm15 = vmor %vm1697_vm14, %vm1698_vm13 }
 0x7b3   : > { %v1694_v55 = vsub.f32 1.0, %v1693_v51  ;;  %v1666_v59 = vmul.f32 %v1665_v52, %v1641_v53 }
 0x7b5   : > { %v1695_v60 = vmul.f32 %v2388_v44, %v1694_v55  ;;  %v2215_v10 = vclamps-f32 %v1666_v59, 1.0 }
 0x7b7   : > { %v1696_v62 = vadd.f32 %v2388_v44, %v1695_v60  ;;  %v1709_v48 = vadd.f32 1.0, %v2215_v10 }
 0x7b9   : > { %v1700_v20 = vsel %vm1699_vm15, %v2388_v44, %v1696_v62  ;;  %v1711_v21 = vmul.f32 %v1709_v48, %v1625_v5 }
 0x7ba   : > { %v1705_v2 = vsel %vm1702_vm0, %v1704_v0, %v1700_v20 }
 0x7bb   : > { %v1706_v3 = vmul.f32 %v1705_v2, %v1681_v63 }
 0x7bd   : > { %v2216_v4 = vclamps-f32 %v1706_v3, 1.0 }
 0x7bf   : > { %v1710_v12 = vadd.f32 1.0, %v2216_v4 }
 0x7c1   : > { %v1712_v7 = vmul.f32 %v1710_v12, %v1626_v6 }
 0x7c3   : > { %v1713_v8 = vpack.c.bf16 %v1712_v7, %v1711_v21 }
 0x7c5   : > { %2233 = vmatmul.msk.bf16.vlgmr.msrb.gmra.mxu0 %vm1750_vm1, %v1713_v8 }
 0x842   : > { %v1763_v9 = vpop.f32.mrf.mxu0 }
 0x843   : > { %v1764_v11 = vadd.f32 %v2358_v57, %v1763_v9 }
 0x845   : > { %v1768_v13 = vadd.f32 %v1764_v11, %v2881_v58 }
 0x847   : > { %1770 = vst.msk [vmem:[#allocation2] sm:$0xff] %vm1082_vm3, %v1768_v13 }
 0x84a   : > { %v1765_v47 = vpop.f32.mrf.mxu0 }
 0x84b   : > { %v1766_v14 = vadd.f32 %v2358_v57, %v1765_v47  ;;  %1775 = sbr.rel (%p2234_p1) target bundleno = 2532 (0x9e4), region = 120 }
 0x84d   : > { %v1769_v54 = vadd.f32 %v1766_v14, %v2887_v1 }
 0x84f   : > { %1771 = vst.msk [vmem:[#allocation2 + $0x8] sm:$0x1] %vm1086_vm4, %v1769_v54 }
 0x850   : > { %v1780_v15 = vsel %vm1086_vm4, %v1768_v13, 0.0  ;;  %1776 = vst.msk [vmem:[%s2772_s21] sm:$0xff] %vm1082_vm3, %v1768_v13  ;;  %v2275_v19 = vld [vmem:[%s3131_s23 + $0x8] sm:$0xff]  ;;  %v2274_v22 = vld [vmem:[%s3131_s23] sm:$0xff]  ;;  %vm1838_vm6 = vcmask 32768  }
 0x851   : > { %1781 = vadd.xlane.f32.xlu0 %v1780_v15  ;;  %1777 = vst.msk [vmem:[%s2772_s21 + $0x8] sm:$0x1] %vm1086_vm4, %v1769_v54  ;;  %1831 = vmatpush.bf16.msra.mxu0 %v2275_v19  ;;  %v1778_v33 = vld [vmem:[%s3132_s1] sm:$0x1] }
 0x852   : > { %v1809_v39 = vld [vmem:[%s3134_s10] sm:$0x1] }
 0x855   : > { %1832 = vmatpush.bf16.msra.mxu0 %v2274_v22 }
 0x8c4   : > { %v1782_v58 = vpop.xlane.xlu0 %1781 }
 0x8c5   : > { %v1783_v16 = vmul.f32 %v1782_v58, %v2807_v25 }
 0x8c7   : > { %v1784_v17 = vsub.f32 %v1768_v13, %v1783_v16 }
 0x8c9   : > { %v1785_v18 = vmul.f32 %v1784_v17, %v1784_v17 }
 0x8cb   : > { %v1786_v1 = vsel %vm1086_vm4, %v1785_v18, 0.0 }
 0x8cc   : > { %1787 = vadd.xlane.f32.xlu0 %v1786_v1 }
 0x93f   : > { %v1788_v23 = vpop.xlane.xlu0 %1787 }
 0x940   : > { %v1789_v24 = vmul.f32 %v1788_v23, %v2807_v25  ;;  %v1779_v25 = vld [vmem:[%s3133_s3] sm:$0x1] }
 0x942   : > { %v1790_v27 = vadd.f32 1e-05, %v1789_v24 }
 0x944   : > { %2389 = vrsqrt.f32 %v1790_v27  ;;  %vm1797_vm2 = vweird.f32 %v1790_v27 }
 0x94a   : > { %v2390_v26 = vpop.eup %2389 }
 0x94b   : > { %v1792_v28 = vmul.f32 %v2390_v26, %v1790_v27  ;;  %vm1798_vm4 = vweird.f32 %v2390_v26 }
 0x94c   : > { %vm1799_vm5 = vmor %vm1797_vm2, %vm1798_vm4 }
 0x94d   : > { %v1793_v29 = vmul.f32 %v2390_v26, %v1792_v28 }
 0x94f   : > { %v1794_v30 = vmul.f32 0.5, %v1793_v29 }
 0x951   : > { %v1795_v31 = vsub.f32 1.5, %v1794_v30 }
 0x953   : > { %v1796_v32 = vmul.f32 %v2390_v26, %v1795_v31 }
 0x955   : > { %v1800_v34 = vsel %vm1799_vm5, %v2390_v26, %v1796_v32 }
 0x956   : > { %v1801_v35 = vmul.f32 %v1800_v34, %v1784_v17 }
 0x958   : > { %v1802_v36 = vmul.f32 %v1801_v35, %v1778_v33 }
 0x95a   : > { %v1803_v37 = vadd.f32 %v1802_v36, %v1779_v25 }
 0x95c   : > { %v1804_v38 = vpack.c.bf16 %v1803_v37, %v1803_v37 }
 0x95e   : > { %2243 = vmatmul.msk.bf16.vlgmr.msra.gmra.mxu0 %vm1082_vm3, %v1804_v38 }
 0x9db   : > { %v1834_v40 = vpop.f32.mrf.mxu0 }
 0x9dc   : > { %v1835_v41 = vadd.f32 %v1834_v40, %v1809_v39 }
 0x9de   : > { %1839 = vst.msk [vmem:[%s2776_s28] sm:$0x1] %vm1838_vm6, %v1835_v41 }
 0x9e3   : > { %v1836_v42 = vpop.f32.mrf.mxu0 }
 0x9e4 PF: > { %s3135_s27 = sld [smem:[#allocation9_spill]]  ;;  %s1859_s8 = sshll.u32 %s2776_s28, 4  ;;  %s1860_s8 = int_to_ptr.vmem [resolvable:$true] %s1859_s8 }
 0x9e5   : > { %s3136_s19 = sld [smem:[#allocation40_spill]]  ;;  %s3138_s24 = sand.u32 1, %s2461_s26  }
 0x9e6   : > { %s1846_s2 = scalar_lea.sflag [#allocation4], %s3138_s24 }
 0x9eb   : > { %s1857_s30 = scalar_lea.hbm %s3136_s19, %s3135_s27  ;;  %s2411_s25 = scalar_lea.hbm %s3136_s19, 2 }
 0x9ec   : > { %s1861_s13 = sshll.u32 %s1857_s30, 4  ;;  %s1862_s13 = int_to_ptr.hbm [resolvable:$true] %s1861_s13 }
 0x9ed   : > { %s2405_s22 = sshra.s32 %s1862_s13, 4  ;;  %s2406_s22 = int_to_ptr.hbm [resolvable:$true] %s2405_s22 }
 0x9ee   : > { %s2407_s12 = scalar_lea.hbm %s2406_s22, 1  ;;  %p2412_p6 = scmp.lt.s32.totalorder %s2406_s22, %s3136_s19 }
 0x9ef   : > { %p2408_p2 = scmp.ne.s32.totalorder %s2406_s22, %s2407_s12  ;;  %p2413_p7 = scmp.lt.s32.totalorder %s2411_s25, %s2407_s12 }
 0x9f1   : > { %p2409_p4 = pnand %p2408_p2, %p2665_p3  ;;  %p2414_p8 = por %p2413_p7, %p2412_p6 }
 0x9f3   : > { %p2410_p5 = pneg %p2409_p4 }
 0x9f5   : > { %p2415_p10 = pnand %p2414_p8, %p2410_p5 }
 0x9f7   : > { %2418 = shalt.err (!%p2415_p10)
}
 0x9f8   : > { %2276 = dma.vmem_to_hbm [thread:$0]  (%p2665_p3), %s1860_s8, 16, %s1862_s13, %s1846_s2  }
 0x9f9 PF: > { %s3139_s28 = sld [smem:[#allocation12_spill]] }
 0x9fa   : > { %s3140_s1 = sld [smem:[#allocation6_spill]] }
 0x9ff   : > { %p2282_p11 = scmp.ge.s32.totalorder %s3139_s28, 2 }
 0xa00   : > { %s1881_s18 = sand.u32 1, %s3140_s1  }
 0xa01   : > { %p2279_p12 = pnand %p2282_p11, %p2675_p9  ;;  %s1882_s3 = scalar_lea.sflag [#allocation4], %s1881_s18 }
 0xa03   : > { %p2280_p13 = pneg %p2279_p12 }
 0xa05   : > { %2452 = dma.done.wait (%p2280_p13), %s1882_s3, 16  }
 0xa06   : > { %2454 = vsyncadd (%p2280_p13), %s1882_s3, 4294967280  ;;  %s38_s0 = sadd.s32 1, %s3139_s28   ;;  %s3142_s9 = sld [smem:[#allocation7_spill]] }
 0xa07   : > { %p35_p0 = scmp.ge.s32.totalorder %s38_s0, 6   ;;  %s3143_s27 = sld [smem:[#allocation17_spill]] }
 0xa08   : > { %s3144_s28 = sld [smem:[#allocation10_spill]]  ;;  %s3148_s5 = smov %s2461_s26 }
 0xa09   : > { %s3145_s6 = sld [smem:[#allocation11_spill]]  ;;  %37 = sbr.rel (!%p35_p0) target bundleno = 28 (0x1c), region = 215 }
 0xa0a   : > { %s3146_s2 = sld [smem:[#allocation13_spill]] }
 0xa0b   : > { %s3147_s29 = sld [smem:[#allocation15_spill]] }
 0xa0c   : > { %s3149_s26 = smov %s3142_s9 }
 0xa0e   :  { %1887 = vsyncpa [#allocation4], 1 }
 0xa0f   :  { %1889 = vsyncpa [#allocation4 + $0x1], 1 }

</bundles_post_ra>
